<compile_context>
chip_gen: v7x
topology: tpu7x:2x2x1
jax: 0.10.0
libtpu: 0.0.40
codegen_flags: <defaults>
</compile_context>

<pallas_src>
import numpy as np
import jax
import jax.numpy as jnp
from jax.experimental import pallas as pl
from jax.experimental.pallas import tpu as pltpu


# -------------------- kernel-side elementwise helpers --------------------

def _gelu(x):
    # tanh-approximation GELU (single EUP tanh instead of an erf polynomial)
    c = 0.7978845608028654  # sqrt(2/pi)
    return 0.5 * x * (1.0 + jnp.tanh(c * (x + 0.044715 * x * x * x)))


def _elu(x):
    return jnp.where(x > 0, x, jnp.exp(jnp.minimum(x, 0.0)) - 1.0)


# -------------------- glue: time one-hot (reference only) --------------------

def create_T_one_hot_jax(length, dataset_max_len, T):
    B = length.shape[0]
    time_range = jnp.broadcast_to(jnp.arange(T, dtype=jnp.int32)[None, :], (B, T))
    pos = jax.nn.one_hot(time_range, dataset_max_len, dtype=jnp.float32)
    inv = length[:, None].astype(jnp.int32) - 1 - time_range
    mask = (inv >= 0).astype(jnp.float32)
    inv_c = jnp.clip(inv, 0, None)
    neg = jax.nn.one_hot(inv_c, dataset_max_len, dtype=jnp.float32)
    return jnp.concatenate([pos, neg], axis=-1) * mask[..., None]


# -------------------- glue: time embedding without the one-hot matmul --------

def time_embed_gather(length, max_seq_len, T, te_w, te_b):
    """Equivalent to Linear(create_T_one_hot(length)) but as a row gather."""
    B = length.shape[0]
    time_range = jnp.broadcast_to(jnp.arange(T, dtype=jnp.int32)[None, :], (B, T))
    inv = length[:, None].astype(jnp.int32) - 1 - time_range
    mask = (inv >= 0).astype(jnp.float32)
    inv_c = jnp.clip(inv, 0, None)
    WT = te_w.T                                        # (2*max_seq_len, te_dim)
    pos = jnp.take(WT, time_range, axis=0)             # (B, T, te_dim)
    neg = jnp.take(WT, max_seq_len + inv_c, axis=0)    # (B, T, te_dim)
    return mask[..., None] * (pos + neg) + te_b[None, None, :]


# -------------------- glue: AutoregFeedforward masks --------------------

def make_autoreg_masks(c_in, c_out_per_in, ar_hidden, E, hd2, c_offset=0):
    m1 = np.ones((E * (c_in - 1), 3 * (c_in - 1)), np.float32)
    for c in range(c_offset, c_in - 1):
        m1[:E * c, c * 3:(c + 1) * 3] = 0
        m1[E * (c + 1):, c * 3:(c + 1) * 3] = 0
        m1[E * c:E * (c + 1), :c * 3] = 0
        m1[E * c:E * (c + 1), (c + 1) * 3:] = 0
    m2 = np.ones((hd2 * c_in, ar_hidden + E * (c_in - 1)), np.float32)
    for c in range(c_in):
        m2[hd2 * c:hd2 * (c + 1), ar_hidden + E * (c_offset + max(0, c - c_offset)):] = 0
    m3 = np.ones((c_out_per_in * c_in, hd2 * c_in), np.float32)
    for c in range(c_in):
        m3[:c_out_per_in * c, hd2 * c:hd2 * (c + 1)] = 0
        m3[c_out_per_in * (c + 1):, hd2 * c:hd2 * (c + 1)] = 0
    return jnp.asarray(m1), jnp.asarray(m2), jnp.asarray(m3)


# -------------------- Pallas kernel --------------------

def _make_kernel(B_pad, T, H, c_in, mm_dtype):
    TB = B_pad * T
    H4 = 4 * H

    def kernel(x_ref, te_ref,
               w_ie1, b_ie1, w_ie2, b_ie2,
               w_ih_inp, w_ih_te, w_hh_cat, b_cat,
               gate_scale, gate_offset,
               w_net, b_net,
               w_f_id, w_f_ep, w_f_en, b_ff,
               w_h_a, w_h_b, b_h, w_out, b_out,
               out_ref,
               gates_sc, hs):
        f32 = jnp.float32

        def mm(a, w_ref):
            # non-recurrent matmuls; mm_dtype=bf16 on v6e/v7x for 2x MXU rate
            return jnp.dot(a.astype(mm_dtype), w_ref[...].astype(mm_dtype),
                           preferred_element_type=f32)

        x = x_ref[...]                      # (TB, c_in), time-major rows t*B_pad + b
        te = te_ref[...]                    # (TB, te_dim)

        # ---- input_embed: Linear -> GELU -> Linear -> GELU ----
        h1 = _gelu(mm(x, w_ie1) + b_ie1[...])
        inp_embed = _gelu(mm(h1, w_ie2) + b_ie2[...])

        # ---- fused, bias-folded, pre-scaled input-side gate pre-activations ----
        # Lane layout of the 4H axis: [i | f | g | o] (PyTorch gate order).
        # i/f/o rows were pre-scaled by 0.5 in the wrapper (sigmoid-as-tanh).
        # Kept f32 (feeds the recurrent feedback loop).
        gx = (jnp.dot(inp_embed, w_ih_inp[...], preferred_element_type=f32) +
              jnp.dot(te, w_ih_te[...], preferred_element_type=f32) +
              b_cat[...])                                           # (TB, 4H)
        # right-shift by one timestep: block 0 = bias only (zero input vector)
        gates_sc[pl.ds(0, B_pad), :] = jnp.broadcast_to(b_cat[...], (B_pad, H4))
        gates_sc[pl.ds(B_pad, TB - B_pad), :] = gx[:TB - B_pad, :]

        # hoisted loop invariants (JAX does not CSE broadcast_in_dim)
        whh = w_hh_cat[...]                                          # (H, 4H)
        g_scale = jnp.broadcast_to(gate_scale[...], (B_pad, H4))
        g_off = jnp.broadcast_to(gate_offset[...], (B_pad, H4))

        # ---- batched LSTM recurrence: one fused (H,4H) matmul + 2 tanh / step ----
        def step(t, carry):
            h, c = carry
            r = pl.multiple_of(t * B_pad, B_pad)
            pre = (jnp.dot(h, whh, preferred_element_type=f32) +
                   gates_sc[pl.ds(r, B_pad), :])                     # (B_pad, 4H)
            y = jnp.tanh(pre) * g_scale + g_off     # i/f/o -> sigmoid, g -> tanh
            i_g = y[:, 0:H]
            f_g = y[:, H:2 * H]
            g_g = y[:, 2 * H:3 * H]
            o_g = y[:, 3 * H:4 * H]
            c_new = f_g * c + i_g * g_g
            h_new = o_g * jnp.tanh(c_new)
            hs[pl.ds(r, B_pad), :] = h_new
            return (h_new, c_new)

        zero_state = jnp.zeros((B_pad, H), f32)
        jax.lax.fori_loop(0, T, step, (zero_state, zero_state), unroll=min(8, T))

        # ---- net: Dropout(id) -> Linear -> GELU -> Dropout(id) ----
        feats = _gelu(mm(hs[...], w_net) + b_net[...])

        # ---- AutoregFeedforward (weights pre-masked & pre-split in the wrapper) ----
        inps = x[:, :c_in - 1]
        in_feat = _gelu(mm(inps, w_f_id) + mm(_elu(inps), w_f_ep) +
                        mm(_elu(-inps), w_f_en) + b_ff[...])
        hidden = _gelu(mm(feats, w_h_a) + mm(in_feat, w_h_b) + b_h[...])
        # lane-dense (128-wide) padded output store; sliced to c_out in the wrapper
        out_ref[...] = mm(hidden, w_out) + b_out[...]

    return kernel


# -------------------- parameter init (deterministic, synthetic) --------------------

def init_params(key, c_in, c_out, hidden_size, max_seq_len):
    hs2 = hidden_size // 2
    te_dim = hidden_size // 8
    H = hidden_size
    cpi = c_out // c_in
    E = min(max(1, int(hs2 * 9.0 / 16.0 / (c_in - 1))), 96)
    hd2 = hs2 // 2

    ks = jax.random.split(key, 11)

    def lin(k, out_f, in_f):
        kw, kb = jax.random.split(k)
        w = jax.random.normal(kw, (out_f, in_f), jnp.float32) * 0.1
        b = jax.random.normal(kb, (out_f,), jnp.float32) * 0.1
        return w, b

    p = {}
    p['te_w'], p['te_b'] = lin(ks[0], te_dim, 2 * max_seq_len)
    p['ie1_w'], p['ie1_b'] = lin(ks[1], hs2, c_in)
    p['ie2_w'], p['ie2_b'] = lin(ks[2], hs2 - te_dim, hs2)
    p['w_ih'] = jax.random.normal(ks[3], (4 * H, hs2), jnp.float32) * 0.1
    p['w_hh'] = jax.random.normal(ks[4], (4 * H, H), jnp.float32) * 0.1
    p['b_ih'] = jax.random.normal(ks[5], (4 * H,), jnp.float32) * 0.1
    p['b_hh'] = jax.random.normal(ks[6], (4 * H,), jnp.float32) * 0.1
    p['net_w'], p['net_b'] = lin(ks[7], hs2, H)
    p['f_w'], p['f_b'] = lin(ks[8], E * (c_in - 1), 3 * (c_in - 1))
    p['h_w'], p['h_b'] = lin(ks[9], hd2 * c_in, hs2 + E * (c_in - 1))
    p['o_w'], p['o_b'] = lin(ks[10], cpi * c_in, hd2 * c_in)
    return p


# -------------------- forward (wrapper around pallas_call) --------------------

def lstm_feature_model_forward(params, x, length, *, c_in, c_out, hidden_size,
                               max_seq_len, matmul_dtype=jnp.float32):
    B, T, _ = x.shape
    H = hidden_size
    hs2 = H // 2
    te_dim = H // 8
    inp_dim = hs2 - te_dim
    cpi = c_out // c_in
    E = min(max(1, int(hs2 * 9.0 / 16.0 / (c_in - 1))), 96)
    hd2 = hs2 // 2

    B_pad = ((B + 7) // 8) * 8                      # pad batch to 8 sublanes
    TB = T * B_pad
    OUT_PAD = max(128, ((cpi * c_in + 127) // 128) * 128)

    # ---- wrapper-side glue (pure JAX) ----
    x_pad = jnp.zeros((B_pad, T, c_in), jnp.float32).at[:B].set(x.astype(jnp.float32))
    length_pad = jnp.full((B_pad,), T, jnp.int32).at[:B].set(length.astype(jnp.int32))

    # time embedding as a row gather of the time-embed weights (no one-hot matmul)
    te = time_embed_gather(length_pad, max_seq_len, T, params['te_w'], params['te_b'])

    # time-major flatten: row index = t * B_pad + b
    x_tm = x_pad.transpose(1, 0, 2).reshape(TB, c_in)
    te_tm = te.transpose(1, 0, 2).reshape(TB, te_dim)

    # autoregressive masks applied to weights (AutoregFeedforward._mask_layers)
    m1, m2, m3 = make_autoreg_masks(c_in, cpi, hs2, E, hd2)
    f_w = params['f_w'] * m1
    h_w = params['h_w'] * m2
    o_w = params['o_w'] * m3

    # pre-transpose weights so the kernel only does `x @ W + b`
    w_ie1, b_ie1 = params['ie1_w'].T, params['ie1_b'][None, :]
    w_ie2, b_ie2 = params['ie2_w'].T, params['ie2_b'][None, :]

    # ---- fused LSTM gate weights, gate order [i|f|g|o] along the 4H lane axis ----
    # sigmoid(z) = 0.5*tanh(z/2) + 0.5  ->  pre-scale i/f/o rows & biases by 0.5,
    # then one tanh over all 4H lanes + a lane-constant FMA in the kernel.
    Wih, Whh = params['w_ih'], params['w_hh']                     # (4H, hs2), (4H, H)
    b_lstm = params['b_ih'] + params['b_hh']                      # (4H,)
    pre_scale = jnp.concatenate([jnp.full((H,), 0.5), jnp.full((H,), 0.5),
                                 jnp.full((H,), 1.0), jnp.full((H,), 0.5)])
    Wih_s = Wih * pre_scale[:, None]
    Whh_s = Whh * pre_scale[:, None]
    w_ih_inp = Wih_s[:, :inp_dim].T                               # (inp_dim, 4H)
    w_ih_te = Wih_s[:, inp_dim:].T                                # (te_dim, 4H)
    w_hh_cat = Whh_s.T                                            # (H, 4H)
    b_cat = (b_lstm * pre_scale)[None, :]                         # (1, 4H)
    gate_scale = jnp.concatenate([jnp.full((H,), 0.5), jnp.full((H,), 0.5),
                                  jnp.full((H,), 1.0), jnp.full((H,), 0.5)])[None, :]
    gate_offset = jnp.concatenate([jnp.full((H,), 0.5), jnp.full((H,), 0.5),
                                   jnp.full((H,), 0.0), jnp.full((H,), 0.5)])[None, :]

    w_net, b_net = params['net_w'].T, params['net_b'][None, :]

    f_wT = f_w.T                                                  # (3*(c_in-1), E*(c_in-1))
    w_f_id, w_f_ep, w_f_en = f_wT[0::3, :], f_wT[1::3, :], f_wT[2::3, :]
    b_ff = params['f_b'][None, :]
    h_wT = h_w.T                                                  # (hs2+E*(c_in-1), hd2*c_in)
    w_h_a, w_h_b = h_wT[:hs2, :], h_wT[hs2:, :]
    b_h = params['h_b'][None, :]

    # lane-pad the output projection to a multiple of 128 lanes
    w_out = jnp.zeros((hd2 * c_in, OUT_PAD), jnp.float32).at[:, :cpi * c_in].set(o_w.T)
    b_out = jnp.zeros((1, OUT_PAD), jnp.float32).at[:, :cpi * c_in].set(params['o_b'][None, :])

    kernel = _make_kernel(B_pad, T, H, c_in, matmul_dtype)
    inputs = (x_tm, te_tm, w_ie1, b_ie1, w_ie2, b_ie2,
              w_ih_inp, w_ih_te, w_hh_cat, b_cat, gate_scale, gate_offset,
              w_net, b_net,
              w_f_id, w_f_ep, w_f_en, b_ff,
              w_h_a, w_h_b, b_h, w_out, b_out)

    out_tm = pl.pallas_call(
        kernel,
        out_shape=jax.ShapeDtypeStruct((TB, OUT_PAD), jnp.float32),
        in_specs=[pl.BlockSpec(memory_space=pltpu.MemorySpace.VMEM)] * len(inputs),
        out_specs=pl.BlockSpec(memory_space=pltpu.MemorySpace.VMEM),
        scratch_shapes=[pltpu.VMEM((TB, 4 * H), jnp.float32),   # fused gate pre-acts
                        pltpu.VMEM((TB, H), jnp.float32)],      # LSTM hidden states
        compiler_params=pltpu.CompilerParams(vmem_limit_bytes=32 * 1024 * 1024),
    )(*inputs)

    out = out_tm.reshape(T, B_pad, OUT_PAD).transpose(1, 0, 2)
    return out[:B, :, :cpi * c_in]


# -------------------- pure-JAX reference (exact activations) --------------------

def ref_forward(params, x, length, c_in, c_out, hidden_size, max_seq_len):
    B, T, _ = x.shape
    H = hidden_size
    hs2 = H // 2
    cpi = c_out // c_in
    E = min(max(1, int(hs2 * 9.0 / 16.0 / (c_in - 1))), 96)
    hd2 = hs2 // 2

    gelu = lambda v: jax.nn.gelu(v, approximate=False)   # exact erf GELU (PyTorch default)
    sigmoid = jax.nn.sigmoid

    def lin(xx, w, b):
        return xx @ w.T + b

    h1 = gelu(lin(x, params['ie1_w'], params['ie1_b']))
    inp_embed = gelu(lin(h1, params['ie2_w'], params['ie2_b']))
    toh = create_T_one_hot_jax(length, max_seq_len, T)
    time_emb = lin(toh, params['te_w'], params['te_b'])
    embed = jnp.concatenate([inp_embed, time_emb], axis=-1)
    embed = jnp.concatenate([jnp.zeros((B, 1, hs2), jnp.float32), embed[:, :-1]], axis=1)

    h = jnp.zeros((B, H), jnp.float32)
    c = jnp.zeros((B, H), jnp.float32)
    outs = []
    for t in range(T):
        g = embed[:, t] @ params['w_ih'].T + params['b_ih'] + h @ params['w_hh'].T + params['b_hh']
        i_g = sigmoid(g[:, :H])
        f_g = sigmoid(g[:, H:2 * H])
        g_g = jnp.tanh(g[:, 2 * H:3 * H])
        o_g = sigmoid(g[:, 3 * H:])
        c = f_g * c + i_g * g_g
        h = o_g * jnp.tanh(c)
        outs.append(h)
    lstm_out = jnp.stack(outs, axis=1)
    feats = gelu(lin(lstm_out, params['net_w'], params['net_b']))

    m1, m2, m3 = make_autoreg_masks(c_in, cpi, hs2, E, hd2)
    f_w, h_w, o_w = params['f_w'] * m1, params['h_w'] * m2, params['o_w'] * m3
    inps = x[..., :c_in - 1]
    stacked = jnp.stack([inps, jax.nn.elu(inps), jax.nn.elu(-inps)], axis=-1).reshape(
        x.shape[:-1] + (3 * (c_in - 1),))
    in_feat = gelu(lin(stacked, f_w, params['f_b']))
    ff = jnp.concatenate([feats, in_feat], axis=-1)
    hid = gelu(lin(ff, h_w, params['h_b']))
    return lin(hid, o_w, params['o_b'])


# -------------------- main --------------------

if __name__ == "__main__":
    B, T = 2, 8
    c_in, c_out = 4, 8
    hidden_size = 32
    max_seq_len = 16

    key = jax.random.PRNGKey(0)
    kx, kp = jax.random.split(key)
    x = jax.random.normal(kx, (B, T, c_in), jnp.float32)
    length = jnp.full((B,), T, jnp.int32)

    params = init_params(kp, c_in, c_out, hidden_size, max_seq_len)

    out = lstm_feature_model_forward(params, x, length, c_in=c_in, c_out=c_out,
                                     hidden_size=hidden_size, max_seq_len=max_seq_len)
    out = jax.block_until_ready(out)

    ref = jax.block_until_ready(
        ref_forward(params, x, length, c_in, c_out, hidden_size, max_seq_len))

    assert out.shape == (B, T, c_out), out.shape
    # kernel uses tanh-approx GELU (EUP) vs the exact erf-GELU reference;
    # LSTM gates are now exact (tanh-form sigmoid, no approx reciprocal).
    np.testing.assert_allclose(np.asarray(out), np.asarray(ref), atol=5e-3, rtol=2e-2)
    print("KERNEL_OK")
</pallas_src>

<mosaic_0001>
module attributes {stable_mosaic.version = 11 : i64} {
  func.func @kernel(%arg0: memref<64x4xf32, #tpu.memory_space<vmem>>, %arg1: memref<64x4xf32, #tpu.memory_space<vmem>>, %arg2: memref<4x16xf32, #tpu.memory_space<vmem>>, %arg3: memref<1x16xf32, #tpu.memory_space<vmem>>, %arg4: memref<16x12xf32, #tpu.memory_space<vmem>>, %arg5: memref<1x12xf32, #tpu.memory_space<vmem>>, %arg6: memref<12x128xf32, #tpu.memory_space<vmem>>, %arg7: memref<4x128xf32, #tpu.memory_space<vmem>>, %arg8: memref<32x128xf32, #tpu.memory_space<vmem>>, %arg9: memref<1x128xf32, #tpu.memory_space<vmem>>, %arg10: memref<1x128xf32, #tpu.memory_space<vmem>>, %arg11: memref<1x128xf32, #tpu.memory_space<vmem>>, %arg12: memref<32x16xf32, #tpu.memory_space<vmem>>, %arg13: memref<1x16xf32, #tpu.memory_space<vmem>>, %arg14: memref<3x9xf32, #tpu.memory_space<vmem>>, %arg15: memref<3x9xf32, #tpu.memory_space<vmem>>, %arg16: memref<3x9xf32, #tpu.memory_space<vmem>>, %arg17: memref<1x9xf32, #tpu.memory_space<vmem>>, %arg18: memref<16x32xf32, #tpu.memory_space<vmem>>, %arg19: memref<9x32xf32, #tpu.memory_space<vmem>>, %arg20: memref<1x32xf32, #tpu.memory_space<vmem>>, %arg21: memref<32x128xf32, #tpu.memory_space<vmem>>, %arg22: memref<1x128xf32, #tpu.memory_space<vmem>>, %arg23: memref<64x128xf32, #tpu.memory_space<vmem>>, %arg24: memref<64x128xf32, #tpu.memory_space<vmem>>, %arg25: memref<64x32xf32, #tpu.memory_space<vmem>>) attributes {dimension_semantics = [], scalar_prefetch = 0 : i64, scratch_operands = 2 : i64, tpu.core_type = #tpu.core_type<tc>} {
    %c0 = arith.constant 0 : index
    %c0_0 = arith.constant 0 : index
    %0 = vector.load %arg0[%c0, %c0_0] : memref<64x4xf32, #tpu.memory_space<vmem>>, vector<64x4xf32>
    %c0_1 = arith.constant 0 : index
    %c0_2 = arith.constant 0 : index
    %1 = vector.load %arg1[%c0_1, %c0_2] : memref<64x4xf32, #tpu.memory_space<vmem>>, vector<64x4xf32>
    %c0_3 = arith.constant 0 : index
    %c0_4 = arith.constant 0 : index
    %2 = vector.load %arg2[%c0_3, %c0_4] : memref<4x16xf32, #tpu.memory_space<vmem>>, vector<4x16xf32>
    %cst = arith.constant dense<0.000000e+00> : vector<64x16xf32>
    %3 = tpu.matmul %0, %2, %cst {dimension_numbers = #tpu.dot_dimension_numbers<[1], [0], [0], [1], [0, 0, 1, 1], [], []>} : vector<64x4xf32>, vector<4x16xf32>, vector<64x16xf32> -> vector<64x16xf32>
    %c0_5 = arith.constant 0 : index
    %c0_6 = arith.constant 0 : index
    %4 = vector.load %arg3[%c0_5, %c0_6] : memref<1x16xf32, #tpu.memory_space<vmem>>, vector<1x16xf32>
    %5 = vector.broadcast %4 : vector<1x16xf32> to vector<64x16xf32>
    %6 = arith.addf %3, %5 : vector<64x16xf32>
    %cst_7 = arith.constant 5.000000e-01 : f32
    %7 = vector.broadcast %cst_7 : f32 to vector<64x16xf32>
    %8 = arith.mulf %7, %6 : vector<64x16xf32>
    %cst_8 = arith.constant 4.471500e-02 : f32
    %9 = vector.broadcast %cst_8 : f32 to vector<64x16xf32>
    %10 = arith.mulf %9, %6 : vector<64x16xf32>
    %11 = arith.mulf %10, %6 : vector<64x16xf32>
    %12 = arith.mulf %11, %6 : vector<64x16xf32>
    %13 = arith.addf %6, %12 : vector<64x16xf32>
    %cst_9 = arith.constant 0.797884583 : f32
    %14 = vector.broadcast %cst_9 : f32 to vector<64x16xf32>
    %15 = arith.mulf %14, %13 : vector<64x16xf32>
    %16 = math.tanh %15 : vector<64x16xf32>
    %cst_10 = arith.constant 1.000000e+00 : f32
    %17 = vector.broadcast %cst_10 : f32 to vector<64x16xf32>
    %18 = arith.addf %17, %16 : vector<64x16xf32>
    %19 = arith.mulf %8, %18 : vector<64x16xf32>
    %c0_11 = arith.constant 0 : index
    %c0_12 = arith.constant 0 : index
    %20 = vector.load %arg4[%c0_11, %c0_12] : memref<16x12xf32, #tpu.memory_space<vmem>>, vector<16x12xf32>
    %cst_13 = arith.constant dense<0.000000e+00> : vector<64x12xf32>
    %21 = tpu.matmul %19, %20, %cst_13 {dimension_numbers = #tpu.dot_dimension_numbers<[1], [0], [0], [1], [0, 0, 1, 1], [], []>} : vector<64x16xf32>, vector<16x12xf32>, vector<64x12xf32> -> vector<64x12xf32>
    %c0_14 = arith.constant 0 : index
    %c0_15 = arith.constant 0 : index
    %22 = vector.load %arg5[%c0_14, %c0_15] : memref<1x12xf32, #tpu.memory_space<vmem>>, vector<1x12xf32>
    %23 = vector.broadcast %22 : vector<1x12xf32> to vector<64x12xf32>
    %24 = arith.addf %21, %23 : vector<64x12xf32>
    %cst_16 = arith.constant 5.000000e-01 : f32
    %25 = vector.broadcast %cst_16 : f32 to vector<64x12xf32>
    %26 = arith.mulf %25, %24 : vector<64x12xf32>
    %cst_17 = arith.constant 4.471500e-02 : f32
    %27 = vector.broadcast %cst_17 : f32 to vector<64x12xf32>
    %28 = arith.mulf %27, %24 : vector<64x12xf32>
    %29 = arith.mulf %28, %24 : vector<64x12xf32>
    %30 = arith.mulf %29, %24 : vector<64x12xf32>
    %31 = arith.addf %24, %30 : vector<64x12xf32>
    %cst_18 = arith.constant 0.797884583 : f32
    %32 = vector.broadcast %cst_18 : f32 to vector<64x12xf32>
    %33 = arith.mulf %32, %31 : vector<64x12xf32>
    %34 = math.tanh %33 : vector<64x12xf32>
    %cst_19 = arith.constant 1.000000e+00 : f32
    %35 = vector.broadcast %cst_19 : f32 to vector<64x12xf32>
    %36 = arith.addf %35, %34 : vector<64x12xf32>
    %37 = arith.mulf %26, %36 : vector<64x12xf32>
    %c0_20 = arith.constant 0 : index
    %c0_21 = arith.constant 0 : index
    %38 = vector.load %arg6[%c0_20, %c0_21] : memref<12x128xf32, #tpu.memory_space<vmem>>, vector<12x128xf32>
    %cst_22 = arith.constant dense<0.000000e+00> : vector<64x128xf32>
    %39 = tpu.matmul %37, %38, %cst_22 {dimension_numbers = #tpu.dot_dimension_numbers<[1], [0], [0], [1], [0, 0, 1, 1], [], []>} : vector<64x12xf32>, vector<12x128xf32>, vector<64x128xf32> -> vector<64x128xf32>
    %c0_23 = arith.constant 0 : index
    %c0_24 = arith.constant 0 : index
    %40 = vector.load %arg7[%c0_23, %c0_24] : memref<4x128xf32, #tpu.memory_space<vmem>>, vector<4x128xf32>
    %cst_25 = arith.constant dense<0.000000e+00> : vector<64x128xf32>
    %41 = tpu.matmul %1, %40, %cst_25 {dimension_numbers = #tpu.dot_dimension_numbers<[1], [0], [0], [1], [0, 0, 1, 1], [], []>} : vector<64x4xf32>, vector<4x128xf32>, vector<64x128xf32> -> vector<64x128xf32>
    %42 = arith.addf %39, %41 : vector<64x128xf32>
    %c0_26 = arith.constant 0 : index
    %c0_27 = arith.constant 0 : index
    %43 = vector.load %arg9[%c0_26, %c0_27] : memref<1x128xf32, #tpu.memory_space<vmem>>, vector<1x128xf32>
    %44 = vector.broadcast %43 : vector<1x128xf32> to vector<64x128xf32>
    %45 = arith.addf %42, %44 : vector<64x128xf32>
    %c0_28 = arith.constant 0 : index
    %c0_29 = arith.constant 0 : index
    %46 = vector.load %arg9[%c0_28, %c0_29] : memref<1x128xf32, #tpu.memory_space<vmem>>, vector<1x128xf32>
    %47 = vector.shape_cast %46 : vector<1x128xf32> to vector<1x128xf32>
    %48 = vector.broadcast %47 : vector<1x128xf32> to vector<8x128xf32>
    %c0_30 = arith.constant 0 : index
    %c0_31 = arith.constant 0 : index
    %49 = vector.load %arg24[%c0_30, %c0_31] : memref<64x128xf32, #tpu.memory_space<vmem>>, vector<8x128xf32>
    tpu.vector_store %arg24[%c0_30, %c0_31], %48 {strides = array<i32>} : memref<64x128xf32, #tpu.memory_space<vmem>>, vector<8x128xf32>,
    %50 = vector.extract_strided_slice %45 {offsets = [0, 0], sizes = [56, 128], strides = [1, 1]} : vector<64x128xf32> to vector<56x128xf32>
    %c8 = arith.constant 8 : index
    %c0_32 = arith.constant 0 : index
    %51 = vector.load %arg24[%c8, %c0_32] : memref<64x128xf32, #tpu.memory_space<vmem>>, vector<56x128xf32>
    tpu.vector_store %arg24[%c8, %c0_32], %50 {strides = array<i32>} : memref<64x128xf32, #tpu.memory_space<vmem>>, vector<56x128xf32>,
    %c0_33 = arith.constant 0 : index
    %c0_34 = arith.constant 0 : index
    %52 = vector.load %arg8[%c0_33, %c0_34] : memref<32x128xf32, #tpu.memory_space<vmem>>, vector<32x128xf32>
    %c0_35 = arith.constant 0 : index
    %c0_36 = arith.constant 0 : index
    %53 = vector.load %arg10[%c0_35, %c0_36] : memref<1x128xf32, #tpu.memory_space<vmem>>, vector<1x128xf32>
    %54 = vector.shape_cast %53 : vector<1x128xf32> to vector<1x128xf32>
    %55 = vector.broadcast %54 : vector<1x128xf32> to vector<8x128xf32>
    %c0_37 = arith.constant 0 : index
    %c0_38 = arith.constant 0 : index
    %56 = vector.load %arg11[%c0_37, %c0_38] : memref<1x128xf32, #tpu.memory_space<vmem>>, vector<1x128xf32>
    %57 = vector.shape_cast %56 : vector<1x128xf32> to vector<1x128xf32>
    %58 = vector.broadcast %57 : vector<1x128xf32> to vector<8x128xf32>
    %cst_39 = arith.constant 0.000000e+00 : f32
    %59 = vector.broadcast %cst_39 : f32 to vector<8x32xf32>
    %c0_i32 = arith.constant 0 : i32
    %c8_i32 = arith.constant 8 : i32
    %60 = arith.muli %c0_i32, %c8_i32 : i32
    %61 = tpu.assume_multiple %60, 8 : i32
    %cst_40 = arith.constant dense<0.000000e+00> : vector<8x128xf32>
    %62 = tpu.matmul %59, %52, %cst_40 {dimension_numbers = #tpu.dot_dimension_numbers<[1], [0], [0], [1], [0, 0, 1, 1], [], []>} : vector<8x32xf32>, vector<32x128xf32>, vector<8x128xf32> -> vector<8x128xf32>
    %63 = arith.index_cast %61 : i32 to index
    %c0_41 = arith.constant 0 : index
    %64 = vector.load %arg24[%63, %c0_41] : memref<64x128xf32, #tpu.memory_space<vmem>>, vector<8x128xf32>
    %65 = arith.addf %62, %64 : vector<8x128xf32>
    %66 = math.tanh %65 : vector<8x128xf32>
    %67 = arith.mulf %66, %55 : vector<8x128xf32>
    %68 = arith.addf %67, %58 : vector<8x128xf32>
    %69 = vector.extract_strided_slice %68 {offsets = [0, 0], sizes = [8, 32], strides = [1, 1]} : vector<8x128xf32> to vector<8x32xf32>
    %70 = vector.extract_strided_slice %68 {offsets = [0, 32], sizes = [8, 32], strides = [1, 1]} : vector<8x128xf32> to vector<8x32xf32>
    %71 = vector.extract_strided_slice %68 {offsets = [0, 64], sizes = [8, 32], strides = [1, 1]} : vector<8x128xf32> to vector<8x32xf32>
    %72 = vector.extract_strided_slice %68 {offsets = [0, 96], sizes = [8, 32], strides = [1, 1]} : vector<8x128xf32> to vector<8x32xf32>
    %73 = arith.mulf %70, %59 : vector<8x32xf32>
    %74 = arith.mulf %69, %71 : vector<8x32xf32>
    %75 = arith.addf %73, %74 : vector<8x32xf32>
    %76 = math.tanh %75 : vector<8x32xf32>
    %77 = arith.mulf %72, %76 : vector<8x32xf32>
    %78 = arith.index_cast %61 : i32 to index
    %c0_42 = arith.constant 0 : index
    %79 = vector.load %arg25[%78, %c0_42] : memref<64x32xf32, #tpu.memory_space<vmem>>, vector<8x32xf32>
    tpu.vector_store %arg25[%78, %c0_42], %77 {strides = array<i32>} : memref<64x32xf32, #tpu.memory_space<vmem>>, vector<8x32xf32>,
    %c1_i32 = arith.constant 1 : i32
    %c8_i32_43 = arith.constant 8 : i32
    %80 = arith.muli %c1_i32, %c8_i32_43 : i32
    %81 = tpu.assume_multiple %80, 8 : i32
    %cst_44 = arith.constant dense<0.000000e+00> : vector<8x128xf32>
    %82 = tpu.matmul %77, %52, %cst_44 {dimension_numbers = #tpu.dot_dimension_numbers<[1], [0], [0], [1], [0, 0, 1, 1], [], []>} : vector<8x32xf32>, vector<32x128xf32>, vector<8x128xf32> -> vector<8x128xf32>
    %83 = arith.index_cast %81 : i32 to index
    %c0_45 = arith.constant 0 : index
    %84 = vector.load %arg24[%83, %c0_45] : memref<64x128xf32, #tpu.memory_space<vmem>>, vector<8x128xf32>
    %85 = arith.addf %82, %84 : vector<8x128xf32>
    %86 = math.tanh %85 : vector<8x128xf32>
    %87 = arith.mulf %86, %55 : vector<8x128xf32>
    %88 = arith.addf %87, %58 : vector<8x128xf32>
    %89 = vector.extract_strided_slice %88 {offsets = [0, 0], sizes = [8, 32], strides = [1, 1]} : vector<8x128xf32> to vector<8x32xf32>
    %90 = vector.extract_strided_slice %88 {offsets = [0, 32], sizes = [8, 32], strides = [1, 1]} : vector<8x128xf32> to vector<8x32xf32>
    %91 = vector.extract_strided_slice %88 {offsets = [0, 64], sizes = [8, 32], strides = [1, 1]} : vector<8x128xf32> to vector<8x32xf32>
    %92 = vector.extract_strided_slice %88 {offsets = [0, 96], sizes = [8, 32], strides = [1, 1]} : vector<8x128xf32> to vector<8x32xf32>
    %93 = arith.mulf %90, %75 : vector<8x32xf32>
    %94 = arith.mulf %89, %91 : vector<8x32xf32>
    %95 = arith.addf %93, %94 : vector<8x32xf32>
    %96 = math.tanh %95 : vector<8x32xf32>
    %97 = arith.mulf %92, %96 : vector<8x32xf32>
    %98 = arith.index_cast %81 : i32 to index
    %c0_46 = arith.constant 0 : index
    %99 = vector.load %arg25[%98, %c0_46] : memref<64x32xf32, #tpu.memory_space<vmem>>, vector<8x32xf32>
    tpu.vector_store %arg25[%98, %c0_46], %97 {strides = array<i32>} : memref<64x32xf32, #tpu.memory_space<vmem>>, vector<8x32xf32>,
    %c2_i32 = arith.constant 2 : i32
    %c8_i32_47 = arith.constant 8 : i32
    %100 = arith.muli %c2_i32, %c8_i32_47 : i32
    %101 = tpu.assume_multiple %100, 8 : i32
    %cst_48 = arith.constant dense<0.000000e+00> : vector<8x128xf32>
    %102 = tpu.matmul %97, %52, %cst_48 {dimension_numbers = #tpu.dot_dimension_numbers<[1], [0], [0], [1], [0, 0, 1, 1], [], []>} : vector<8x32xf32>, vector<32x128xf32>, vector<8x128xf32> -> vector<8x128xf32>
    %103 = arith.index_cast %101 : i32 to index
    %c0_49 = arith.constant 0 : index
    %104 = vector.load %arg24[%103, %c0_49] : memref<64x128xf32, #tpu.memory_space<vmem>>, vector<8x128xf32>
    %105 = arith.addf %102, %104 : vector<8x128xf32>
    %106 = math.tanh %105 : vector<8x128xf32>
    %107 = arith.mulf %106, %55 : vector<8x128xf32>
    %108 = arith.addf %107, %58 : vector<8x128xf32>
    %109 = vector.extract_strided_slice %108 {offsets = [0, 0], sizes = [8, 32], strides = [1, 1]} : vector<8x128xf32> to vector<8x32xf32>
    %110 = vector.extract_strided_slice %108 {offsets = [0, 32], sizes = [8, 32], strides = [1, 1]} : vector<8x128xf32> to vector<8x32xf32>
    %111 = vector.extract_strided_slice %108 {offsets = [0, 64], sizes = [8, 32], strides = [1, 1]} : vector<8x128xf32> to vector<8x32xf32>
    %112 = vector.extract_strided_slice %108 {offsets = [0, 96], sizes = [8, 32], strides = [1, 1]} : vector<8x128xf32> to vector<8x32xf32>
    %113 = arith.mulf %110, %95 : vector<8x32xf32>
    %114 = arith.mulf %109, %111 : vector<8x32xf32>
    %115 = arith.addf %113, %114 : vector<8x32xf32>
    %116 = math.tanh %115 : vector<8x32xf32>
    %117 = arith.mulf %112, %116 : vector<8x32xf32>
    %118 = arith.index_cast %101 : i32 to index
    %c0_50 = arith.constant 0 : index
    %119 = vector.load %arg25[%118, %c0_50] : memref<64x32xf32, #tpu.memory_space<vmem>>, vector<8x32xf32>
    tpu.vector_store %arg25[%118, %c0_50], %117 {strides = array<i32>} : memref<64x32xf32, #tpu.memory_space<vmem>>, vector<8x32xf32>,
    %c3_i32 = arith.constant 3 : i32
    %c8_i32_51 = arith.constant 8 : i32
    %120 = arith.muli %c3_i32, %c8_i32_51 : i32
    %121 = tpu.assume_multiple %120, 8 : i32
    %cst_52 = arith.constant dense<0.000000e+00> : vector<8x128xf32>
    %122 = tpu.matmul %117, %52, %cst_52 {dimension_numbers = #tpu.dot_dimension_numbers<[1], [0], [0], [1], [0, 0, 1, 1], [], []>} : vector<8x32xf32>, vector<32x128xf32>, vector<8x128xf32> -> vector<8x128xf32>
    %123 = arith.index_cast %121 : i32 to index
    %c0_53 = arith.constant 0 : index
    %124 = vector.load %arg24[%123, %c0_53] : memref<64x128xf32, #tpu.memory_space<vmem>>, vector<8x128xf32>
    %125 = arith.addf %122, %124 : vector<8x128xf32>
    %126 = math.tanh %125 : vector<8x128xf32>
    %127 = arith.mulf %126, %55 : vector<8x128xf32>
    %128 = arith.addf %127, %58 : vector<8x128xf32>
    %129 = vector.extract_strided_slice %128 {offsets = [0, 0], sizes = [8, 32], strides = [1, 1]} : vector<8x128xf32> to vector<8x32xf32>
    %130 = vector.extract_strided_slice %128 {offsets = [0, 32], sizes = [8, 32], strides = [1, 1]} : vector<8x128xf32> to vector<8x32xf32>
    %131 = vector.extract_strided_slice %128 {offsets = [0, 64], sizes = [8, 32], strides = [1, 1]} : vector<8x128xf32> to vector<8x32xf32>
    %132 = vector.extract_strided_slice %128 {offsets = [0, 96], sizes = [8, 32], strides = [1, 1]} : vector<8x128xf32> to vector<8x32xf32>
    %133 = arith.mulf %130, %115 : vector<8x32xf32>
    %134 = arith.mulf %129, %131 : vector<8x32xf32>
    %135 = arith.addf %133, %134 : vector<8x32xf32>
    %136 = math.tanh %135 : vector<8x32xf32>
    %137 = arith.mulf %132, %136 : vector<8x32xf32>
    %138 = arith.index_cast %121 : i32 to index
    %c0_54 = arith.constant 0 : index
    %139 = vector.load %arg25[%138, %c0_54] : memref<64x32xf32, #tpu.memory_space<vmem>>, vector<8x32xf32>
    tpu.vector_store %arg25[%138, %c0_54], %137 {strides = array<i32>} : memref<64x32xf32, #tpu.memory_space<vmem>>, vector<8x32xf32>,
    %c4_i32 = arith.constant 4 : i32
    %c8_i32_55 = arith.constant 8 : i32
    %140 = arith.muli %c4_i32, %c8_i32_55 : i32
    %141 = tpu.assume_multiple %140, 8 : i32
    %cst_56 = arith.constant dense<0.000000e+00> : vector<8x128xf32>
    %142 = tpu.matmul %137, %52, %cst_56 {dimension_numbers = #tpu.dot_dimension_numbers<[1], [0], [0], [1], [0, 0, 1, 1], [], []>} : vector<8x32xf32>, vector<32x128xf32>, vector<8x128xf32> -> vector<8x128xf32>
    %143 = arith.index_cast %141 : i32 to index
    %c0_57 = arith.constant 0 : index
    %144 = vector.load %arg24[%143, %c0_57] : memref<64x128xf32, #tpu.memory_space<vmem>>, vector<8x128xf32>
    %145 = arith.addf %142, %144 : vector<8x128xf32>
    %146 = math.tanh %145 : vector<8x128xf32>
    %147 = arith.mulf %146, %55 : vector<8x128xf32>
    %148 = arith.addf %147, %58 : vector<8x128xf32>
    %149 = vector.extract_strided_slice %148 {offsets = [0, 0], sizes = [8, 32], strides = [1, 1]} : vector<8x128xf32> to vector<8x32xf32>
    %150 = vector.extract_strided_slice %148 {offsets = [0, 32], sizes = [8, 32], strides = [1, 1]} : vector<8x128xf32> to vector<8x32xf32>
    %151 = vector.extract_strided_slice %148 {offsets = [0, 64], sizes = [8, 32], strides = [1, 1]} : vector<8x128xf32> to vector<8x32xf32>
    %152 = vector.extract_strided_slice %148 {offsets = [0, 96], sizes = [8, 32], strides = [1, 1]} : vector<8x128xf32> to vector<8x32xf32>
    %153 = arith.mulf %150, %135 : vector<8x32xf32>
    %154 = arith.mulf %149, %151 : vector<8x32xf32>
    %155 = arith.addf %153, %154 : vector<8x32xf32>
    %156 = math.tanh %155 : vector<8x32xf32>
    %157 = arith.mulf %152, %156 : vector<8x32xf32>
    %158 = arith.index_cast %141 : i32 to index
    %c0_58 = arith.constant 0 : index
    %159 = vector.load %arg25[%158, %c0_58] : memref<64x32xf32, #tpu.memory_space<vmem>>, vector<8x32xf32>
    tpu.vector_store %arg25[%158, %c0_58], %157 {strides = array<i32>} : memref<64x32xf32, #tpu.memory_space<vmem>>, vector<8x32xf32>,
    %c5_i32 = arith.constant 5 : i32
    %c8_i32_59 = arith.constant 8 : i32
    %160 = arith.muli %c5_i32, %c8_i32_59 : i32
    %161 = tpu.assume_multiple %160, 8 : i32
    %cst_60 = arith.constant dense<0.000000e+00> : vector<8x128xf32>
    %162 = tpu.matmul %157, %52, %cst_60 {dimension_numbers = #tpu.dot_dimension_numbers<[1], [0], [0], [1], [0, 0, 1, 1], [], []>} : vector<8x32xf32>, vector<32x128xf32>, vector<8x128xf32> -> vector<8x128xf32>
    %163 = arith.index_cast %161 : i32 to index
    %c0_61 = arith.constant 0 : index
    %164 = vector.load %arg24[%163, %c0_61] : memref<64x128xf32, #tpu.memory_space<vmem>>, vector<8x128xf32>
    %165 = arith.addf %162, %164 : vector<8x128xf32>
    %166 = math.tanh %165 : vector<8x128xf32>
    %167 = arith.mulf %166, %55 : vector<8x128xf32>
    %168 = arith.addf %167, %58 : vector<8x128xf32>
    %169 = vector.extract_strided_slice %168 {offsets = [0, 0], sizes = [8, 32], strides = [1, 1]} : vector<8x128xf32> to vector<8x32xf32>
    %170 = vector.extract_strided_slice %168 {offsets = [0, 32], sizes = [8, 32], strides = [1, 1]} : vector<8x128xf32> to vector<8x32xf32>
    %171 = vector.extract_strided_slice %168 {offsets = [0, 64], sizes = [8, 32], strides = [1, 1]} : vector<8x128xf32> to vector<8x32xf32>
    %172 = vector.extract_strided_slice %168 {offsets = [0, 96], sizes = [8, 32], strides = [1, 1]} : vector<8x128xf32> to vector<8x32xf32>
    %173 = arith.mulf %170, %155 : vector<8x32xf32>
    %174 = arith.mulf %169, %171 : vector<8x32xf32>
    %175 = arith.addf %173, %174 : vector<8x32xf32>
    %176 = math.tanh %175 : vector<8x32xf32>
    %177 = arith.mulf %172, %176 : vector<8x32xf32>
    %178 = arith.index_cast %161 : i32 to index
    %c0_62 = arith.constant 0 : index
    %179 = vector.load %arg25[%178, %c0_62] : memref<64x32xf32, #tpu.memory_space<vmem>>, vector<8x32xf32>
    tpu.vector_store %arg25[%178, %c0_62], %177 {strides = array<i32>} : memref<64x32xf32, #tpu.memory_space<vmem>>, vector<8x32xf32>,
    %c6_i32 = arith.constant 6 : i32
    %c8_i32_63 = arith.constant 8 : i32
    %180 = arith.muli %c6_i32, %c8_i32_63 : i32
    %181 = tpu.assume_multiple %180, 8 : i32
    %cst_64 = arith.constant dense<0.000000e+00> : vector<8x128xf32>
    %182 = tpu.matmul %177, %52, %cst_64 {dimension_numbers = #tpu.dot_dimension_numbers<[1], [0], [0], [1], [0, 0, 1, 1], [], []>} : vector<8x32xf32>, vector<32x128xf32>, vector<8x128xf32> -> vector<8x128xf32>
    %183 = arith.index_cast %181 : i32 to index
    %c0_65 = arith.constant 0 : index
    %184 = vector.load %arg24[%183, %c0_65] : memref<64x128xf32, #tpu.memory_space<vmem>>, vector<8x128xf32>
    %185 = arith.addf %182, %184 : vector<8x128xf32>
    %186 = math.tanh %185 : vector<8x128xf32>
    %187 = arith.mulf %186, %55 : vector<8x128xf32>
    %188 = arith.addf %187, %58 : vector<8x128xf32>
    %189 = vector.extract_strided_slice %188 {offsets = [0, 0], sizes = [8, 32], strides = [1, 1]} : vector<8x128xf32> to vector<8x32xf32>
    %190 = vector.extract_strided_slice %188 {offsets = [0, 32], sizes = [8, 32], strides = [1, 1]} : vector<8x128xf32> to vector<8x32xf32>
    %191 = vector.extract_strided_slice %188 {offsets = [0, 64], sizes = [8, 32], strides = [1, 1]} : vector<8x128xf32> to vector<8x32xf32>
    %192 = vector.extract_strided_slice %188 {offsets = [0, 96], sizes = [8, 32], strides = [1, 1]} : vector<8x128xf32> to vector<8x32xf32>
    %193 = arith.mulf %190, %175 : vector<8x32xf32>
    %194 = arith.mulf %189, %191 : vector<8x32xf32>
    %195 = arith.addf %193, %194 : vector<8x32xf32>
    %196 = math.tanh %195 : vector<8x32xf32>
    %197 = arith.mulf %192, %196 : vector<8x32xf32>
    %198 = arith.index_cast %181 : i32 to index
    %c0_66 = arith.constant 0 : index
    %199 = vector.load %arg25[%198, %c0_66] : memref<64x32xf32, #tpu.memory_space<vmem>>, vector<8x32xf32>
    tpu.vector_store %arg25[%198, %c0_66], %197 {strides = array<i32>} : memref<64x32xf32, #tpu.memory_space<vmem>>, vector<8x32xf32>,
    %c7_i32 = arith.constant 7 : i32
    %c8_i32_67 = arith.constant 8 : i32
    %200 = arith.muli %c7_i32, %c8_i32_67 : i32
    %201 = tpu.assume_multiple %200, 8 : i32
    %cst_68 = arith.constant dense<0.000000e+00> : vector<8x128xf32>
    %202 = tpu.matmul %197, %52, %cst_68 {dimension_numbers = #tpu.dot_dimension_numbers<[1], [0], [0], [1], [0, 0, 1, 1], [], []>} : vector<8x32xf32>, vector<32x128xf32>, vector<8x128xf32> -> vector<8x128xf32>
    %203 = arith.index_cast %201 : i32 to index
    %c0_69 = arith.constant 0 : index
    %204 = vector.load %arg24[%203, %c0_69] : memref<64x128xf32, #tpu.memory_space<vmem>>, vector<8x128xf32>
    %205 = arith.addf %202, %204 : vector<8x128xf32>
    %206 = math.tanh %205 : vector<8x128xf32>
    %207 = arith.mulf %206, %55 : vector<8x128xf32>
    %208 = arith.addf %207, %58 : vector<8x128xf32>
    %209 = vector.extract_strided_slice %208 {offsets = [0, 0], sizes = [8, 32], strides = [1, 1]} : vector<8x128xf32> to vector<8x32xf32>
    %210 = vector.extract_strided_slice %208 {offsets = [0, 32], sizes = [8, 32], strides = [1, 1]} : vector<8x128xf32> to vector<8x32xf32>
    %211 = vector.extract_strided_slice %208 {offsets = [0, 64], sizes = [8, 32], strides = [1, 1]} : vector<8x128xf32> to vector<8x32xf32>
    %212 = vector.extract_strided_slice %208 {offsets = [0, 96], sizes = [8, 32], strides = [1, 1]} : vector<8x128xf32> to vector<8x32xf32>
    %213 = arith.mulf %210, %195 : vector<8x32xf32>
    %214 = arith.mulf %209, %211 : vector<8x32xf32>
    %215 = arith.addf %213, %214 : vector<8x32xf32>
    %216 = math.tanh %215 : vector<8x32xf32>
    %217 = arith.mulf %212, %216 : vector<8x32xf32>
    %218 = arith.index_cast %201 : i32 to index
    %c0_70 = arith.constant 0 : index
    %219 = vector.load %arg25[%218, %c0_70] : memref<64x32xf32, #tpu.memory_space<vmem>>, vector<8x32xf32>
    tpu.vector_store %arg25[%218, %c0_70], %217 {strides = array<i32>} : memref<64x32xf32, #tpu.memory_space<vmem>>, vector<8x32xf32>,
    %c8_i32_71 = arith.constant 8 : i32
    %c0_72 = arith.constant 0 : index
    %c0_73 = arith.constant 0 : index
    %220 = vector.load %arg25[%c0_72, %c0_73] : memref<64x32xf32, #tpu.memory_space<vmem>>, vector<64x32xf32>
    %c0_74 = arith.constant 0 : index
    %c0_75 = arith.constant 0 : index
    %221 = vector.load %arg12[%c0_74, %c0_75] : memref<32x16xf32, #tpu.memory_space<vmem>>, vector<32x16xf32>
    %cst_76 = arith.constant dense<0.000000e+00> : vector<64x16xf32>
    %222 = tpu.matmul %220, %221, %cst_76 {dimension_numbers = #tpu.dot_dimension_numbers<[1], [0], [0], [1], [0, 0, 1, 1], [], []>} : vector<64x32xf32>, vector<32x16xf32>, vector<64x16xf32> -> vector<64x16xf32>
    %c0_77 = arith.constant 0 : index
    %c0_78 = arith.constant 0 : index
    %223 = vector.load %arg13[%c0_77, %c0_78] : memref<1x16xf32, #tpu.memory_space<vmem>>, vector<1x16xf32>
    %224 = vector.broadcast %223 : vector<1x16xf32> to vector<64x16xf32>
    %225 = arith.addf %222, %224 : vector<64x16xf32>
    %cst_79 = arith.constant 5.000000e-01 : f32
    %226 = vector.broadcast %cst_79 : f32 to vector<64x16xf32>
    %227 = arith.mulf %226, %225 : vector<64x16xf32>
    %cst_80 = arith.constant 4.471500e-02 : f32
    %228 = vector.broadcast %cst_80 : f32 to vector<64x16xf32>
    %229 = arith.mulf %228, %225 : vector<64x16xf32>
    %230 = arith.mulf %229, %225 : vector<64x16xf32>
    %231 = arith.mulf %230, %225 : vector<64x16xf32>
    %232 = arith.addf %225, %231 : vector<64x16xf32>
    %cst_81 = arith.constant 0.797884583 : f32
    %233 = vector.broadcast %cst_81 : f32 to vector<64x16xf32>
    %234 = arith.mulf %233, %232 : vector<64x16xf32>
    %235 = math.tanh %234 : vector<64x16xf32>
    %cst_82 = arith.constant 1.000000e+00 : f32
    %236 = vector.broadcast %cst_82 : f32 to vector<64x16xf32>
    %237 = arith.addf %236, %235 : vector<64x16xf32>
    %238 = arith.mulf %227, %237 : vector<64x16xf32>
    %239 = vector.extract_strided_slice %0 {offsets = [0, 0], sizes = [64, 3], strides = [1, 1]} : vector<64x4xf32> to vector<64x3xf32>
    %c0_83 = arith.constant 0 : index
    %c0_84 = arith.constant 0 : index
    %240 = vector.load %arg14[%c0_83, %c0_84] : memref<3x9xf32, #tpu.memory_space<vmem>>, vector<3x9xf32>
    %cst_85 = arith.constant dense<0.000000e+00> : vector<64x9xf32>
    %241 = tpu.matmul %239, %240, %cst_85 {dimension_numbers = #tpu.dot_dimension_numbers<[1], [0], [0], [1], [0, 0, 1, 1], [], []>} : vector<64x3xf32>, vector<3x9xf32>, vector<64x9xf32> -> vector<64x9xf32>
    %cst_86 = arith.constant 0.000000e+00 : f32
    %242 = vector.broadcast %cst_86 : f32 to vector<64x3xf32>
    %243 = arith.cmpf ogt, %239, %242 : vector<64x3xf32>
    %cst_87 = arith.constant 0.000000e+00 : f32
    %244 = vector.broadcast %cst_87 : f32 to vector<64x3xf32>
    %245 = arith.minimumf %239, %244 : vector<64x3xf32>
    %246 = math.exp %245 : vector<64x3xf32>
    %cst_88 = arith.constant 1.000000e+00 : f32
    %247 = vector.broadcast %cst_88 : f32 to vector<64x3xf32>
    %248 = arith.subf %246, %247 : vector<64x3xf32>
    %249 = arith.select %243, %239, %248 : vector<64x3xi1>, vector<64x3xf32>
    %c0_89 = arith.constant 0 : index
    %c0_90 = arith.constant 0 : index
    %250 = vector.load %arg15[%c0_89, %c0_90] : memref<3x9xf32, #tpu.memory_space<vmem>>, vector<3x9xf32>
    %cst_91 = arith.constant dense<0.000000e+00> : vector<64x9xf32>
    %251 = tpu.matmul %249, %250, %cst_91 {dimension_numbers = #tpu.dot_dimension_numbers<[1], [0], [0], [1], [0, 0, 1, 1], [], []>} : vector<64x3xf32>, vector<3x9xf32>, vector<64x9xf32> -> vector<64x9xf32>
    %252 = arith.addf %241, %251 : vector<64x9xf32>
    %cst_92 = arith.constant 0.000000e+00 : f32
    %253 = vector.broadcast %cst_92 : f32 to vector<64x3xf32>
    %254 = arith.subf %253, %239 : vector<64x3xf32>
    %cst_93 = arith.constant 0.000000e+00 : f32
    %255 = vector.broadcast %cst_93 : f32 to vector<64x3xf32>
    %256 = arith.cmpf ogt, %254, %255 : vector<64x3xf32>
    %cst_94 = arith.constant 0.000000e+00 : f32
    %257 = vector.broadcast %cst_94 : f32 to vector<64x3xf32>
    %258 = arith.minimumf %254, %257 : vector<64x3xf32>
    %259 = math.exp %258 : vector<64x3xf32>
    %cst_95 = arith.constant 1.000000e+00 : f32
    %260 = vector.broadcast %cst_95 : f32 to vector<64x3xf32>
    %261 = arith.subf %259, %260 : vector<64x3xf32>
    %262 = arith.select %256, %254, %261 : vector<64x3xi1>, vector<64x3xf32>
    %c0_96 = arith.constant 0 : index
    %c0_97 = arith.constant 0 : index
    %263 = vector.load %arg16[%c0_96, %c0_97] : memref<3x9xf32, #tpu.memory_space<vmem>>, vector<3x9xf32>
    %cst_98 = arith.constant dense<0.000000e+00> : vector<64x9xf32>
    %264 = tpu.matmul %262, %263, %cst_98 {dimension_numbers = #tpu.dot_dimension_numbers<[1], [0], [0], [1], [0, 0, 1, 1], [], []>} : vector<64x3xf32>, vector<3x9xf32>, vector<64x9xf32> -> vector<64x9xf32>
    %265 = arith.addf %252, %264 : vector<64x9xf32>
    %c0_99 = arith.constant 0 : index
    %c0_100 = arith.constant 0 : index
    %266 = vector.load %arg17[%c0_99, %c0_100] : memref<1x9xf32, #tpu.memory_space<vmem>>, vector<1x9xf32>
    %267 = vector.broadcast %266 : vector<1x9xf32> to vector<64x9xf32>
    %268 = arith.addf %265, %267 : vector<64x9xf32>
    %cst_101 = arith.constant 5.000000e-01 : f32
    %269 = vector.broadcast %cst_101 : f32 to vector<64x9xf32>
    %270 = arith.mulf %269, %268 : vector<64x9xf32>
    %cst_102 = arith.constant 4.471500e-02 : f32
    %271 = vector.broadcast %cst_102 : f32 to vector<64x9xf32>
    %272 = arith.mulf %271, %268 : vector<64x9xf32>
    %273 = arith.mulf %272, %268 : vector<64x9xf32>
    %274 = arith.mulf %273, %268 : vector<64x9xf32>
    %275 = arith.addf %268, %274 : vector<64x9xf32>
    %cst_103 = arith.constant 0.797884583 : f32
    %276 = vector.broadcast %cst_103 : f32 to vector<64x9xf32>
    %277 = arith.mulf %276, %275 : vector<64x9xf32>
    %278 = math.tanh %277 : vector<64x9xf32>
    %cst_104 = arith.constant 1.000000e+00 : f32
    %279 = vector.broadcast %cst_104 : f32 to vector<64x9xf32>
    %280 = arith.addf %279, %278 : vector<64x9xf32>
    %281 = arith.mulf %270, %280 : vector<64x9xf32>
    %c0_105 = arith.constant 0 : index
    %c0_106 = arith.constant 0 : index
    %282 = vector.load %arg18[%c0_105, %c0_106] : memref<16x32xf32, #tpu.memory_space<vmem>>, vector<16x32xf32>
    %cst_107 = arith.constant dense<0.000000e+00> : vector<64x32xf32>
    %283 = tpu.matmul %238, %282, %cst_107 {dimension_numbers = #tpu.dot_dimension_numbers<[1], [0], [0], [1], [0, 0, 1, 1], [], []>} : vector<64x16xf32>, vector<16x32xf32>, vector<64x32xf32> -> vector<64x32xf32>
    %c0_108 = arith.constant 0 : index
    %c0_109 = arith.constant 0 : index
    %284 = vector.load %arg19[%c0_108, %c0_109] : memref<9x32xf32, #tpu.memory_space<vmem>>, vector<9x32xf32>
    %cst_110 = arith.constant dense<0.000000e+00> : vector<64x32xf32>
    %285 = tpu.matmul %281, %284, %cst_110 {dimension_numbers = #tpu.dot_dimension_numbers<[1], [0], [0], [1], [0, 0, 1, 1], [], []>} : vector<64x9xf32>, vector<9x32xf32>, vector<64x32xf32> -> vector<64x32xf32>
    %286 = arith.addf %283, %285 : vector<64x32xf32>
    %c0_111 = arith.constant 0 : index
    %c0_112 = arith.constant 0 : index
    %287 = vector.load %arg20[%c0_111, %c0_112] : memref<1x32xf32, #tpu.memory_space<vmem>>, vector<1x32xf32>
    %288 = vector.broadcast %287 : vector<1x32xf32> to vector<64x32xf32>
    %289 = arith.addf %286, %288 : vector<64x32xf32>
    %cst_113 = arith.constant 5.000000e-01 : f32
    %290 = vector.broadcast %cst_113 : f32 to vector<64x32xf32>
    %291 = arith.mulf %290, %289 : vector<64x32xf32>
    %cst_114 = arith.constant 4.471500e-02 : f32
    %292 = vector.broadcast %cst_114 : f32 to vector<64x32xf32>
    %293 = arith.mulf %292, %289 : vector<64x32xf32>
    %294 = arith.mulf %293, %289 : vector<64x32xf32>
    %295 = arith.mulf %294, %289 : vector<64x32xf32>
    %296 = arith.addf %289, %295 : vector<64x32xf32>
    %cst_115 = arith.constant 0.797884583 : f32
    %297 = vector.broadcast %cst_115 : f32 to vector<64x32xf32>
    %298 = arith.mulf %297, %296 : vector<64x32xf32>
    %299 = math.tanh %298 : vector<64x32xf32>
    %cst_116 = arith.constant 1.000000e+00 : f32
    %300 = vector.broadcast %cst_116 : f32 to vector<64x32xf32>
    %301 = arith.addf %300, %299 : vector<64x32xf32>
    %302 = arith.mulf %291, %301 : vector<64x32xf32>
    %c0_117 = arith.constant 0 : index
    %c0_118 = arith.constant 0 : index
    %303 = vector.load %arg21[%c0_117, %c0_118] : memref<32x128xf32, #tpu.memory_space<vmem>>, vector<32x128xf32>
    %cst_119 = arith.constant dense<0.000000e+00> : vector<64x128xf32>
    %304 = tpu.matmul %302, %303, %cst_119 {dimension_numbers = #tpu.dot_dimension_numbers<[1], [0], [0], [1], [0, 0, 1, 1], [], []>} : vector<64x32xf32>, vector<32x128xf32>, vector<64x128xf32> -> vector<64x128xf32>
    %c0_120 = arith.constant 0 : index
    %c0_121 = arith.constant 0 : index
    %305 = vector.load %arg22[%c0_120, %c0_121] : memref<1x128xf32, #tpu.memory_space<vmem>>, vector<1x128xf32>
    %306 = vector.broadcast %305 : vector<1x128xf32> to vector<64x128xf32>
    %307 = arith.addf %304, %306 : vector<64x128xf32>
    %c0_122 = arith.constant 0 : index
    %c0_123 = arith.constant 0 : index
    %308 = vector.load %arg23[%c0_122, %c0_123] : memref<64x128xf32, #tpu.memory_space<vmem>>, vector<64x128xf32>
    tpu.vector_store %arg23[%c0_122, %c0_123], %307 {strides = array<i32>} : memref<64x128xf32, #tpu.memory_space<vmem>>, vector<64x128xf32>,
    return
  }
}

</mosaic_0001>

<bundles_post_ra>
// kernel: tpu_custom_call.1
= control target key start
LH: loop header
LB: loop body
LE: loop exit
PB: predicated region body
PF: predicated region fallthrough
CT: control target
= control target key end

     0   :  { %s4663_s0 = inlined_call_operand.vmem [shape: f32[64,4], index: 0, kind: input, shape index: {}]   ;;  %s4664_s1 = inlined_call_operand.vmem [shape: f32[64,4], index: 1, kind: input, shape index: {}]   ;;  %s4665_s2 = inlined_call_operand.vmem [shape: f32[4,16], index: 2, kind: input, shape index: {}]   ;;  %s4666_s3 = inlined_call_operand.vmem [shape: f32[1,16], index: 3, kind: input, shape index: {}]   ;;  %s4667_s4 = inlined_call_operand.vmem [shape: f32[16,12], index: 4, kind: input, shape index: {}]   ;;  %s4668_s5 = inlined_call_operand.vmem [shape: f32[1,12], index: 5, kind: input, shape index: {}]   ;;  %s4669_s6 = inlined_call_operand.vmem [shape: f32[12,128], index: 6, kind: input, shape index: {}]   ;;  %s4670_s7 = inlined_call_operand.vmem [shape: f32[4,128], index: 7, kind: input, shape index: {}]   ;;  %s4671_s8 = inlined_call_operand.vmem [shape: f32[32,128], index: 8, kind: input, shape index: {}]   ;;  %s4672_s9 = inlined_call_operand.vmem [shape: f32[1,128], index: 9, kind: input, shape index: {}]   ;;  %s4673_s10 = inlined_call_operand.vmem [shape: f32[1,128], index: 10, kind: input, shape index: {}]   ;;  %s4674_s11 = inlined_call_operand.vmem [shape: f32[1,128], index: 11, kind: input, shape index: {}]   ;;  %s4675_s12 = inlined_call_operand.vmem [shape: f32[32,16], index: 12, kind: input, shape index: {}]   ;;  %s4676_s13 = inlined_call_operand.vmem [shape: f32[1,16], index: 13, kind: input, shape index: {}]   ;;  %s4677_s14 = inlined_call_operand.vmem [shape: f32[3,9], index: 14, kind: input, shape index: {}]   ;;  %s4678_s15 = inlined_call_operand.vmem [shape: f32[3,9], index: 15, kind: input, shape index: {}]   ;;  %s4679_s16 = inlined_call_operand.vmem [shape: f32[3,9], index: 16, kind: input, shape index: {}]   ;;  %s4680_s17 = inlined_call_operand.vmem [shape: f32[1,9], index: 17, kind: input, shape index: {}]   ;;  %s4681_s18 = inlined_call_operand.vmem [shape: f32[16,32], index: 18, kind: input, shape index: {}]   ;;  %s4682_s19 = inlined_call_operand.vmem [shape: f32[9,32], index: 19, kind: input, shape index: {}]   ;;  %s4683_s20 = inlined_call_operand.vmem [shape: f32[1,32], index: 20, kind: input, shape index: {}]   ;;  %s4684_s21 = inlined_call_operand.vmem [shape: f32[32,128], index: 21, kind: input, shape index: {}]   ;;  %s4685_s22 = inlined_call_operand.vmem [shape: f32[1,128], index: 22, kind: input, shape index: {}]   ;;  %s4686_s23 = inlined_call_operand.hbm [shape: f32[64,128], index: 23, kind: output, shape index: {}]  }
   0x1   :  { %4691 = sst [smem:[#allocation7_spill]] %s4663_s0 }
   0x2   :  { %4692 = sst [smem:[#allocation8_spill]] %s4664_s1 }
   0x3   :  { %4693 = sst [smem:[#allocation9_spill]] %s4665_s2 }
   0x4   :  { %4694 = sst [smem:[#allocation10_spill]] %s4666_s3 }
   0x5   :  { %4695 = sst [smem:[#allocation11_spill]] %s4667_s4 }
   0x6   :  { %4696 = sst [smem:[#allocation12_spill]] %s4668_s5 }
   0x7   :  { %4697 = sst [smem:[#allocation13_spill]] %s4669_s6 }
   0x8   :  { %4698 = sst [smem:[#allocation14_spill]] %s4670_s7 }
   0x9   :  { %s4699_s24 = sld [smem:[#allocation9_spill]]  ;;  %vm124_vm0 = vcmask 1043456   ;;  %s4700_s1 = sld [smem:[#allocation7_spill]]  ;;  %vm99_vm1 = vcmask 31744  }
   0xf   :  { %v91_v0 = vld [vmem:[%s4699_s24] sm:$0xf]  ;;  %v76_v2 = vld [vmem:[%s4700_s1 + $0x8] sm:$0xff]  ;;  %v77_v3 = vld [vmem:[%s4700_s1 + $0x10] sm:$0xff] }
  0x10   :  { %v75_v1 = vld [vmem:[%s4700_s1] sm:$0xff]  ;;  %3228 = vmatprep.subr.msk.mxu0 %vm124_vm0, %v91_v0 }
  0x11   :  { %3230 = vmatprep.mubr.msk.f32.mxu0 %vm99_vm1, %v75_v1  ;;  %3229 = vmatpush3.msk.msra.mxu0 %vm124_vm0, %v91_v0 }
  0x12   :  { %3231 = vmatmul.mubr.msk.f32.vlgmr.msra.gmra.mrb[0].mxu0 %vm99_vm1, %v76_v2 }
  0x13   :  { %28 = vsyncpa [#allocation5], 0  ;;  %3233 = vmatprep.mubr.msk.f32.mxu0 %vm99_vm1, %v77_v3  ;;  %v78_v4 = vld [vmem:[%s4700_s1 + $0x18] sm:$0xff]  ;;  %v79_v5 = vld [vmem:[%s4700_s1 + $0x20] sm:$0xff]  ;;  %s4701_s6 = sld [smem:[#allocation11_spill]]  ;;  %v3791_v12 = vmov 0.0|0.0  }
  0x14   :  { %v80_v6 = vld [vmem:[%s4700_s1 + $0x28] sm:$0xff]  ;;  %v81_v7 = vld [vmem:[%s4700_s1 + $0x30] sm:$0xff]  ;;  %v82_v8 = vld [vmem:[%s4700_s1 + $0x38] sm:$0xff]  ;;  %s4702_s3 = sld [smem:[#allocation10_spill]]  ;;  %vm314_vm2 = vcmask 130048   ;;  %vm3792_vm3 = vmmov 0  }
  0x15   :  { %s4703_s27 = sld [smem:[#allocation14_spill]]  ;;  %s4704_s29 = sld [smem:[#allocation8_spill]]  ;;  %vm3794_vm4 = vmmov 1   ;;  %vm650_vm6 = vcmask 97280   ;;  %vm823_vm7 = vcmask 261120   ;;  %vm1917_vm8 = vcmask 1042432  }
  0x16   :  { %3234 = vmatmul.mubr.msk.f32.gmra.mrb[2].mxu0 %vm99_vm1, %v78_v4  ;;  %s4705_s7 = sld [smem:[#allocation13_spill]]  ;;  %vm3495_vm5 = vmpackc.low %vm124_vm0, %vm3794_vm4  ;;  %s4706_s26 = sld [smem:[#allocation12_spill]]  ;;  %vm1892_vm10 = vcmask 23552  }
  0x17   :  { %3236 = vmatprep.mubr.msk.f32.mxu0 %vm99_vm1, %v79_v5 }
  0x19   :  { %v305_v9 = vld [vmem:[%s4701_s6] sm:$0xff]  ;;  %v306_v10 = vld [vmem:[%s4701_s6 + $0x8] sm:$0xff] }
  0x1a   :  { %3237 = vmatmul.mubr.msk.f32.gmra.mrb[4].mxu0 %vm99_vm1, %v80_v6  ;;  %v3490_v11 = vpack.c.bf16 %v306_v10, %v305_v9  ;;  %v2952_v13 = vld [vmem:[%s4702_s3] ss:$0 sm:$0xff] }
  0x1b   :  { %3239 = vmatprep.mubr.msk.f32.mxu0 %vm99_vm1, %v81_v7 }
  0x1c   :  { %3491 = vmatprep.subr.bf16.mxu0 %v3490_v11  ;;  %3574 = vmatprep.subr.bf16.mxu1 %v3490_v11 }
  0x1d   :  { %3493 = vmatpush3.bf16.msra.mxu0 %v3490_v11  ;;  %3575 = vmatpush3.bf16.msra.mxu1 %v3490_v11 }
  0x1e   :  { %3240 = vmatmul.mubr.msk.f32.gmra.mrb[6].mxu0 %vm99_vm1, %v82_v8  ;;  %3500 = vmatprep.subr.bf16.mxu1 %v3791_v12 }
  0xe5   :  { %v3232_v14 = vpop.f32.mrb[0].mxu0 }
  0xe6   :  { %v3967_v15 = vadd.f32 %v3232_v14, %v2952_v13  ;;  %v194_v16 = vpop.f32.mrb[1].mxu0 }
  0xe7   :  { %v195_v17 = vadd.f32 %v2952_v13, %v194_v16 }
  0xe8   :  { %v242_v18 = vmul.f32 0.044715, %v3967_v15  ;;  %v234_v11 = vmul.f32 0.5, %v3967_v15 }
  0xe9   :  { %v241_v19 = vmul.f32 0.044715, %v195_v17  ;;  %v3235_v20 = vpop.f32.mrb[2].mxu0  ;;  %v233_v9 = vmul.f32 0.5, %v195_v17 }
  0xea   :  { %v250_v21 = vmul.f32 %v242_v18, %v3967_v15  ;;  %v3971_v22 = vadd.f32 %v3235_v20, %v2952_v13  ;;  %v204_v23 = vpop.f32.mrb[3].mxu0 }
  0xeb   :  { %v249_v24 = vmul.f32 %v241_v19, %v195_v17  ;;  %v3973_v25 = vadd.f32 %v2952_v13, %v204_v23 }
  0xec   :  { %v258_v26 = vmul.f32 %v250_v21, %v3967_v15  ;;  %v244_v27 = vmul.f32 0.044715, %v3971_v22 }
  0xed   :  { %v257_v28 = vmul.f32 %v249_v24, %v195_v17  ;;  %v243_v29 = vmul.f32 0.044715, %v3973_v25  ;;  %v3238_v30 = vpop.f32.mrb[4].mxu0  ;;  %v235_v20 = vmul.f32 0.5, %v3973_v25 }
  0xee   :  { %v266_v31 = vadd.f32 %v258_v26, %v3967_v15  ;;  %v252_v32 = vmul.f32 %v244_v27, %v3971_v22  ;;  %v3980_v33 = vadd.f32 %v3238_v30, %v2952_v13  ;;  %v214_v34 = vpop.f32.mrb[5].mxu0 }
  0xef   :  { %v265_v35 = vadd.f32 %v257_v28, %v195_v17  ;;  %v251_v36 = vmul.f32 %v243_v29, %v3973_v25  ;;  %v3983_v37 = vadd.f32 %v2952_v13, %v214_v34  ;;  %v236_v17 = vmul.f32 0.5, %v3971_v22  ;;  %v804_v28 = vld [vmem:[%s4671_s8] sm:$0xff]  ;;  %v805_v29 = vld [vmem:[%s4671_s8 + $0x8] sm:$0xff] }
  0xf0   :  { %v274_v38 = vmul.f32 0.7978846, %v266_v31  ;;  %v260_v39 = vmul.f32 %v252_v32, %v3971_v22  ;;  %v246_v40 = vmul.f32 0.044715, %v3980_v33  ;;  %v4024_v34 = vpack.c.bf16 %v805_v29, %v804_v28 }
  0xf1   :  { %v259_v41 = vmul.f32 %v251_v36, %v3973_v25  ;;  %v245_v42 = vmul.f32 0.044715, %v3983_v37  ;;  %v3241_v43 = vpop.f32.mrb[6].mxu0  ;;  %v273_v44 = vmul.f32 0.7978846, %v265_v35 }
  0xf2   :  { %3615 = vtanh.f32 %v274_v38  ;;  %v268_v45 = vadd.f32 %v260_v39, %v3971_v22  ;;  %v254_v46 = vmul.f32 %v246_v40, %v3980_v33  ;;  %v3991_v47 = vadd.f32 %v3241_v43, %v2952_v13  ;;  %v224_v48 = vpop.f32.mrb[7].mxu0  ;;  %v806_v39 = vld [vmem:[%s4671_s8 + $0x10] sm:$0xff] }
  0xf3   :  { %v267_v49 = vadd.f32 %v259_v41, %v3973_v25  ;;  %v3994_v50 = vadd.f32 %v2952_v13, %v224_v48  ;;  %3617 = vtanh.f32 %v273_v44  ;;  %v253_v51 = vmul.f32 %v245_v42, %v3983_v37  ;;  %v84_v48 = vld [vmem:[%s4704_s29 + $0x8] sm:$0xff] }
  0xf4   :  { %v262_v52 = vmul.f32 %v254_v46, %v3980_v33  ;;  %v248_v53 = vmul.f32 0.044715, %v3991_v47  ;;  %v276_v54 = vmul.f32 0.7978846, %v268_v45  ;;  %v237_v25 = vmul.f32 0.5, %v3983_v37 }
  0xf5   :  { %v247_v55 = vmul.f32 0.044715, %v3994_v50  ;;  %v275_v56 = vmul.f32 0.7978846, %v267_v49  ;;  %v261_v57 = vmul.f32 %v253_v51, %v3983_v37  ;;  %v238_v22 = vmul.f32 0.5, %v3980_v33  ;;  %v85_v49 = vld [vmem:[%s4704_s29 + $0x10] sm:$0xff] }
  0xf6   :  { %v270_v58 = vadd.f32 %v262_v52, %v3980_v33  ;;  %v256_v59 = vmul.f32 %v248_v53, %v3991_v47  ;;  %3619 = vtanh.f32 %v276_v54  ;;  %v239_v40 = vmul.f32 0.5, %v3994_v50  ;;  %v518_v46 = vld [vmem:[%s4703_s27] sm:$0xf]  ;;  %v88_v52 = vld [vmem:[%s4704_s29 + $0x28] sm:$0xff] }
  0xf7   :  { %v255_v60 = vmul.f32 %v247_v55, %v3994_v50  ;;  %3621 = vtanh.f32 %v275_v56  ;;  %v269_v61 = vadd.f32 %v261_v57, %v3983_v37  ;;  %v807_v37 = vld [vmem:[%s4671_s8 + $0x18] sm:$0xff]  ;;  %v240_v41 = vmul.f32 0.5, %v3991_v47  ;;  %3258 = vmatprep.subr.msk.mxu0 %vm124_vm0, %v518_v46  ;;  %v87_v51 = vld [vmem:[%s4704_s29 + $0x20] sm:$0xff]  ;;  %v517_v54 = vld [vmem:[%s4705_s7 + $0x8] sm:$0xf] }
  0xf8   :  { %v264_v62 = vmul.f32 %v256_v59, %v3991_v47  ;;  %v278_v63 = vmul.f32 0.7978846, %v270_v58  ;;  %v4037_v43 = vpack.c.bf16 %v807_v37, %v806_v39  ;;  %v3793_v45 = vmov 0.0   ;;  %v516_v53 = vld [vmem:[%s4705_s7] sm:$0xff]  ;;  %v89_v55 = vld [vmem:[%s4704_s29 + $0x30] sm:$0xff]  ;;  %v90_v57 = vld [vmem:[%s4704_s29 + $0x38] sm:$0xff] }
  0xf9   :  { %v263_v0 = vmul.f32 %v255_v60, %v3994_v50  ;;  %v277_v1 = vmul.f32 0.7978846, %v269_v61  ;;  %v3494_v56 = vpack.c.bf16 %v517_v54, %v516_v53  ;;  %v2962_v58 = vld [vmem:[%s4706_s26] ss:$0 sm:$0xff] }
  0xfa   :  { %v272_v2 = vadd.f32 %v264_v62, %v3991_v47  ;;  %3623 = vtanh.f32 %v278_v63  ;;  %v83_v47 = vld [vmem:[%s4704_s29] sm:$0xff] }
  0xfb   :  { %v271_v3 = vadd.f32 %v263_v0, %v3994_v50  ;;  %3625 = vtanh.f32 %v277_v1  ;;  %v86_v50 = vld [vmem:[%s4704_s29 + $0x18] sm:$0xff] }
  0xfc   :  { %v3616_v4 = vpop.eup %3615  ;;  %v280_v5 = vmul.f32 0.7978846, %v272_v2 }
  0xfd   :  { %v3618_v6 = vpop.eup %3617  ;;  %v290_v7 = vadd.f32 1.0, %v3616_v4  ;;  %v279_v8 = vmul.f32 0.7978846, %v271_v3 }
  0xfe   :  { %v289_v10 = vadd.f32 1.0, %v3618_v6  ;;  %3627 = vtanh.f32 %v280_v5 }
  0xff   :  { %3629 = vtanh.f32 %v279_v8  ;;  %v298_v18 = vmul.f32 %v290_v7, %v234_v11 }
 0x100   :  { %v3620_v13 = vpop.eup %3619  ;;  %v297_v14 = vmul.f32 %v289_v10, %v233_v9 }
 0x101   :  { %v3622_v16 = vpop.eup %3621  ;;  %v292_v19 = vadd.f32 1.0, %v3620_v13 }
 0x102   :  { %3246 = vmatprep.mubr.msk.f32.mxu0 %vm314_vm2, %v297_v14  ;;  %v291_v21 = vadd.f32 1.0, %v3622_v16 }
 0x103   :  { %3247 = vmatmul.mubr.msk.f32.vlgmr.msra.gmra.mrb[8].mxu0 %vm314_vm2, %v298_v18  ;;  %v300_v15 = vmul.f32 %v292_v19, %v236_v17 }
 0x104   :  { %v3624_v23 = vpop.eup %3623  ;;  %v299_v24 = vmul.f32 %v291_v21, %v235_v20  ;;  %3259 = vmatpush3.msk.msra.mxu0 %vm124_vm0, %v518_v46 }
 0x105   :  { %v3626_v26 = vpop.eup %3625  ;;  %v294_v27 = vadd.f32 1.0, %v3624_v23  ;;  %3496 = vmatprep.subr.msk.bf16.mxu0 %vm3495_vm5, %v3494_v56 }
 0x106   :  { %3249 = vmatprep.mubr.msk.f32.mxu0 %vm314_vm2, %v299_v24  ;;  %v293_v30 = vadd.f32 1.0, %v3626_v26 }
 0x107   :  { %3250 = vmatmul.mubr.msk.f32.gmra.mrb[10].mxu0 %vm314_vm2, %v300_v15  ;;  %v302_v36 = vmul.f32 %v294_v27, %v238_v22 }
 0x108   :  { %v3628_v31 = vpop.eup %3627  ;;  %v301_v32 = vmul.f32 %v293_v30, %v237_v25  ;;  %3260 = vmatprep.mubr.msk.f32.mxu0 %vm99_vm1, %v83_v47 }
 0x109   :  { %v3630_v35 = vpop.eup %3629  ;;  %v296_v38 = vadd.f32 1.0, %v3628_v31 }
 0x10a   :  { %3252 = vmatprep.mubr.msk.f32.mxu1 %vm314_vm2, %v301_v32  ;;  %v295_v33 = vadd.f32 1.0, %v3630_v35 }
 0x10b   :  { %3253 = vmatmul.mubr.msk.f32.vlgmr.msra.gmra.mrb[0].mxu1 %vm314_vm2, %v302_v36  ;;  %v304_v44 = vmul.f32 %v296_v38, %v240_v41  ;;  %3261 = vmatmul.mubr.msk.f32.vlgmr.msra.gmra.mrb[12].mxu0 %vm99_vm1, %v84_v48  ;;  %v4141_v36 = vld [vmem:[%s4672_s9] ss:$0 sm:$0xff] }
 0x10c   :  { %3502 = vmatpush3.bf16.msra.mxu1 %v4024_v34  ;;  %v303_v42 = vmul.f32 %v295_v33, %v239_v40  ;;  %3263 = vmatprep.mubr.msk.f32.mxu0 %vm99_vm1, %v85_v49 }
 0x10d   :  { %3503 = vmatprep.subr.bf16.mxu1 %v3791_v12  ;;  %3499 = vmatpush3.bf16.msk.msra.mxu0 %vm3495_vm5, %v3494_v56 }
 0x10e   :  { %3255 = vmatprep.mubr.msk.f32.mxu1 %vm314_vm2, %v303_v42  ;;  %3524 = vmatprep.subr.bf16.mxu0 %v3791_v12 }
 0x10f   :  { %3256 = vmatmul.mubr.msk.f32.gmra.mrb[2].mxu1 %vm314_vm2, %v304_v44  ;;  %3264 = vmatmul.mubr.msk.f32.gmra.mrb[14].mxu0 %vm99_vm1, %v86_v50 }
 0x110   :  { %3505 = vmatpush3.bf16.msra.mxu1 %v4037_v43  ;;  %3296 = vmatprep.mubr.msk.f32.mxu1 %vm3792_vm3, %v3793_v45 }
 0x111   :  { %3506 = vmatprep.subr.bf16.mxu1 %v3791_v12  ;;  %3266 = vmatprep.mubr.msk.f32.mxu0 %vm99_vm1, %v87_v51 }
 0x113   :  { %3297 = vmatmul.mubr.f32.vlgmr.msra.gmra.mrb[4].mxu1 %v3793_v45  ;;  %3267 = vmatmul.mubr.msk.f32.gmra.mrb[16].mxu0 %vm99_vm1, %v88_v52 }
 0x114   :  { %3508 = vmatpush3.bf16.msra.mxu1 %v4024_v34  ;;  %3307 = vmatprep.mubr.msk.f32.mxu1 %vm3792_vm3, %v3793_v45 }
 0x115   :  { %3509 = vmatprep.subr.bf16.mxu1 %v3791_v12  ;;  %3269 = vmatprep.mubr.msk.f32.mxu0 %vm99_vm1, %v89_v55 }
 0x117   :  { %3270 = vmatmul.mubr.msk.f32.gmra.mrb[18].mxu0 %vm99_vm1, %v90_v57 }
 0x118   :  { %3511 = vmatpush3.bf16.msra.mxu1 %v4037_v43 }
 0x119   :  { %3512 = vmatprep.subr.bf16.mxu1 %v3791_v12 }
 0x1d6   :  { %v3248_v59 = vpop.f32.mrb[8].mxu0 }
 0x1d7   :  { %v4102_v60 = vadd.f32 %v3248_v59, %v2962_v58  ;;  %v405_v61 = vpop.f32.mrb[9].mxu0 }
 0x1d8   :  { %v4104_v62 = vadd.f32 %v2962_v58, %v405_v61 }
 0x1d9   :  { %v453_v63 = vmul.f32 0.044715, %v4102_v60 }
 0x1da   :  { %v452_v0 = vmul.f32 0.044715, %v4104_v62  ;;  %v3251_v1 = vpop.f32.mrb[10].mxu0 }
 0x1db   :  { %v461_v2 = vmul.f32 %v453_v63, %v4102_v60  ;;  %v4109_v3 = vadd.f32 %v3251_v1, %v2962_v58  ;;  %v415_v4 = vpop.f32.mrb[11].mxu0 }
 0x1dc   :  { %v460_v5 = vmul.f32 %v452_v0, %v4104_v62  ;;  %v4112_v6 = vadd.f32 %v2962_v58, %v415_v4  ;;  %v444_v0 = vmul.f32 0.5, %v4104_v62 }
 0x1dd   :  { %v469_v7 = vmul.f32 %v461_v2, %v4102_v60  ;;  %v455_v8 = vmul.f32 0.044715, %v4109_v3  ;;  %v445_v2 = vmul.f32 0.5, %v4102_v60 }
 0x1de   :  { %v468_v9 = vmul.f32 %v460_v5, %v4104_v62  ;;  %v454_v10 = vmul.f32 0.044715, %v4112_v6  ;;  %v3254_v11 = vpop.f32.mrb[0].mxu1 }
 0x1df   :  { %v477_v13 = vadd.f32 %v469_v7, %v4102_v60  ;;  %v463_v14 = vmul.f32 %v455_v8, %v4109_v3  ;;  %v4120_v16 = vadd.f32 %v3254_v11, %v2962_v58  ;;  %v425_v18 = vpop.f32.mrb[1].mxu1  ;;  %v4161_v7 = vld [vmem:[%s4673_s10] ss:$0 sm:$0xff]  ;;  %s3795_s10 = smov 64  }
 0x1e0   :  { %v476_v19 = vadd.f32 %v468_v9, %v4104_v62  ;;  %v462_v20 = vmul.f32 %v454_v10, %v4112_v6  ;;  %v4124_v21 = vadd.f32 %v2962_v58, %v425_v18  ;;  %v446_v62 = vmul.f32 0.5, %v4112_v6  ;;  %v4168_v60 = vld [vmem:[%s4674_s11] ss:$0 sm:$0xff]  ;;  %s3796_s11 = smov 32  }
 0x1e1   :  { %v485_v17 = vmul.f32 0.7978846, %v477_v13  ;;  %v471_v23 = vmul.f32 %v463_v14, %v4109_v3  ;;  %v457_v24 = vmul.f32 0.044715, %v4120_v16  ;;  %v447_v18 = vmul.f32 0.5, %v4109_v3 }
 0x1e2   :  { %v470_v26 = vmul.f32 %v462_v20, %v4112_v6  ;;  %v456_v15 = vmul.f32 0.044715, %v4124_v21  ;;  %v3257_v27 = vpop.f32.mrb[2].mxu1  ;;  %v484_v28 = vmul.f32 0.7978846, %v476_v19 }
 0x1e3   :  { %3631 = vtanh.f32 %v485_v17  ;;  %v479_v29 = vadd.f32 %v471_v23, %v4109_v3  ;;  %v465_v25 = vmul.f32 %v457_v24, %v4120_v16  ;;  %v4132_v30 = vadd.f32 %v3257_v27, %v2962_v58  ;;  %v435_v22 = vpop.f32.mrb[3].mxu1 }
 0x1e4   :  { %v478_v31 = vadd.f32 %v470_v26, %v4112_v6  ;;  %v464_v32 = vmul.f32 %v456_v15, %v4124_v21  ;;  %v4136_v35 = vadd.f32 %v2962_v58, %v435_v22  ;;  %3633 = vtanh.f32 %v484_v28 }
 0x1e5   :  { %v473_v38 = vmul.f32 %v465_v25, %v4120_v16  ;;  %v459_v39 = vmul.f32 0.044715, %v4132_v30  ;;  %v487_v37 = vmul.f32 0.7978846, %v479_v29  ;;  %v448_v26 = vmul.f32 0.5, %v4124_v21 }
 0x1e6   :  { %v472_v40 = vmul.f32 %v464_v32, %v4124_v21  ;;  %v458_v33 = vmul.f32 0.044715, %v4136_v35  ;;  %v893_v41 = vpop.f32.mrb[4].mxu1  ;;  %v486_v42 = vmul.f32 0.7978846, %v478_v31  ;;  %v449_v3 = vmul.f32 0.5, %v4120_v16 }
 0x1e7   :  { %v481_v44 = vadd.f32 %v473_v38, %v4120_v16  ;;  %v467_v46 = vmul.f32 %v459_v39, %v4132_v30  ;;  %v894_v47 = vadd.f32 %v4141_v36, %v893_v41  ;;  %v3298_v48 = vpop.f32.mrb[5].mxu1  ;;  %3635 = vtanh.f32 %v487_v37 }
 0x1e8   :  { %v480_v49 = vadd.f32 %v472_v40, %v4124_v21  ;;  %v466_v50 = vmul.f32 %v458_v33, %v4136_v35  ;;  %3637 = vtanh.f32 %v486_v42  ;;  %v450_v21 = vmul.f32 0.5, %v4136_v35 }
 0x1e9   :  { %v475_v51 = vmul.f32 %v467_v46, %v4132_v30  ;;  %3639 = vtanh.f32 %v894_v47  ;;  %v489_v52 = vmul.f32 0.7978846, %v481_v44  ;;  %v451_v32 = vmul.f32 0.5, %v4132_v30 }
 0x1ea   :  { %v474_v53 = vmul.f32 %v466_v50, %v4136_v35  ;;  %v488_v54 = vmul.f32 0.7978846, %v480_v49  ;;  %v3271_v39 = vpop.f32.mrb[18].mxu0 }
 0x1eb   :  { %v483_v55 = vadd.f32 %v475_v51, %v4132_v30  ;;  %3641 = vtanh.f32 %v489_v52  ;;  %v642_v37 = vpop.f32.mrb[19].mxu0 }
 0x1ec   :  { %v482_v56 = vadd.f32 %v474_v53, %v4136_v35  ;;  %3643 = vtanh.f32 %v488_v54 }
 0x1ed   :  { %v3632_v57 = vpop.eup %3631  ;;  %v491_v58 = vmul.f32 0.7978846, %v483_v55 }
 0x1ee   :  { %v3634_v59 = vpop.eup %3633  ;;  %v501_v61 = vadd.f32 1.0, %v3632_v57  ;;  %v490_v63 = vmul.f32 0.7978846, %v482_v56 }
 0x1ef   :  { %v500_v1 = vadd.f32 1.0, %v3634_v59  ;;  %3645 = vtanh.f32 %v491_v58 }
 0x1f0   :  { %3647 = vtanh.f32 %v490_v63  ;;  %v509_v9 = vmul.f32 %v501_v61, %v445_v2 }
 0x1f1   :  { %v3636_v4 = vpop.eup %3635  ;;  %v508_v5 = vmul.f32 %v500_v1, %v444_v0 }
 0x1f2   :  { %v3638_v8 = vpop.eup %3637  ;;  %v503_v10 = vadd.f32 1.0, %v3636_v4 }
 0x1f3   :  { %v3640_v11 = vpop.eup %3639  ;;  %3276 = vmatprep.mubr.msk.f32.mxu0 %vm650_vm6, %v508_v5  ;;  %v502_v13 = vadd.f32 1.0, %v3638_v8 }
 0x1f4   :  { %3277 = vmatmul.mubr.msk.f32.vlgmr.msra.gmra.mrb[12].mxu0 %vm650_vm6, %v509_v9  ;;  %v898_v14 = vmul.f32 %v3640_v11, %v4161_v7  ;;  %v511_v6 = vmul.f32 %v503_v10, %v447_v18 }
 0x1f5   :  { %v3642_v19 = vpop.eup %3641  ;;  %v510_v20 = vmul.f32 %v502_v13, %v446_v62  ;;  %3526 = vmatpush3.bf16.msra.mxu0 %v4024_v34 }
 0x1f6   :  { %v3644_v17 = vpop.eup %3643  ;;  %v899_v23 = vadd.f32 %v4168_v60, %v898_v14  ;;  %v505_v24 = vadd.f32 1.0, %v3642_v19  ;;  %3527 = vmatprep.subr.bf16.mxu0 %v3791_v12 }
 0x1f7   :  { %3279 = vmatprep.mubr.msk.f32.mxu0 %vm650_vm6, %v510_v20  ;;  %v504_v15 = vadd.f32 1.0, %v3644_v17 }
 0x1f8   :  { %902 = vrot.lane.b32.xlu0 %v899_v23, %s3795_s10  ;;  %3280 = vmatmul.mubr.msk.f32.gmra.mrb[14].mxu0 %vm650_vm6, %v511_v6  ;;  %v513_v25 = vmul.f32 %v505_v24, %v449_v3  ;;  %v900_v50 = vmul.f32 0.0, %v899_v23 }
 0x1f9   :  { %v3646_v27 = vpop.eup %3645  ;;  %v512_v28 = vmul.f32 %v504_v15, %v448_v26  ;;  %3529 = vmatpush3.bf16.msra.mxu0 %v4037_v43 }
 0x1fa   :  { %v3648_v29 = vpop.eup %3647  ;;  %v507_v22 = vadd.f32 1.0, %v3646_v27  ;;  %3536 = vmatprep.subr.bf16.mxu0 %v3791_v12 }
 0x1fb   :  { %3282 = vmatprep.mubr.msk.f32.mxu0 %vm650_vm6, %v512_v28  ;;  %v506_v31 = vadd.f32 1.0, %v3648_v29 }
 0x1fc   :  { %3283 = vmatmul.mubr.msk.f32.gmra.mrb[16].mxu0 %vm650_vm6, %v513_v25  ;;  %v515_v16 = vmul.f32 %v507_v22, %v451_v32 }
 0x1fd   :  { %v514_v38 = vmul.f32 %v506_v31, %v450_v21 }
 0x1ff   :  { %3285 = vmatprep.mubr.msk.f32.mxu0 %vm650_vm6, %v514_v38 }
 0x200   :  { %3286 = vmatmul.mubr.msk.f32.gmra.mrb[20].mxu0 %vm650_vm6, %v515_v16 }
 0x201   :  { %3340 = vmatprep.mubr.msk.f32.mxu0 %vm3792_vm3, %v3793_v45 }
 0x26a   :  { %v903_v40 = vpop.permute.xlu0 %902 }
 0x26b   :  { %v905_v33 = vmul.f32 %v903_v40, %v899_v23 }
 0x26d   :  { %907 = vrot.lane.b32.xlu0 %v905_v33, %s3796_s11 }
 0x2c7   :  { %v3278_v35 = vpop.f32.mrb[12].mxu0 }
 0x2c8   :  { %v744_v41 = vpop.f32.mrb[13].mxu0  ;;  %v790_v14 = vadd.f32 %v3278_v35, %v4141_v36 }
 0x2c9   :  { %v789_v57 = vadd.f32 %v4141_v36, %v744_v41 }
 0x2cb   :  { %v4192_v42 = vpop.f32.mrb[14].mxu0 }
 0x2cc   :  { %v4194_v30 = vpop.f32.mrb[15].mxu0 }
 0x2cd   :  { %v791_v21 = vadd.f32 %v4141_v36, %v4194_v30 }
 0x2cf   :  { %v4196_v44 = vpop.f32.mrb[16].mxu0 }
 0x2d0   :  { %v4198_v46 = vpop.f32.mrb[17].mxu0 }
 0x2d3   :  { %v3287_v47 = vpop.f32.mrb[20].mxu0 }
 0x2d4   :  { %v774_v48 = vpop.f32.mrb[21].mxu0 }
 0x2d5   :  { %v4200_v49 = vadd.f32 %v774_v48, %v642_v37 }
 0x2df   :  { %v908_v51 = vpop.permute.xlu0 %907 }
 0x2e0   :  { %v910_v52 = vadd.f32 %v908_v51, %v900_v50 }
 0x2e2   :  { %3649 = vtanh.f32 %v910_v52 }
 0x2ec   :  { %v3650_v53 = vpop.eup %3649 }
 0x2ed   :  { %913 = vrot.lane.b32.xlu1 %v3650_v53, %s3795_s10 }
 0x35f   :  { %v914_v54 = vpop.permute.xlu1 %913 }
 0x360   :  { %v916_v55 = vmul.f32 %v914_v54, %v899_v23 }
 0x362   :  { %918 = vrot.lane.b32.xlu1 %v916_v55, %s3796_s11 }
 0x3d4   :  { %v919_v56 = vpop.permute.xlu1 %918 }
 0x3d5   :  { %921 = vst.msk [vmem:[#allocation3] sm:$0xff] %vm823_vm7, %v919_v56  ;;  %3308 = vmatmul.mubr.msk.f32.vlgmr.msra.gmra.mrb[6].mxu1 %vm823_vm7, %v919_v56 }
 0x3d6   :  { %3514 = vmatpush3.bf16.msra.mxu1 %v4024_v34  ;;  %3318 = vmatprep.mubr.msk.f32.mxu1 %vm3792_vm3, %v3793_v45 }
 0x3d7   :  { %3515 = vmatprep.subr.bf16.mxu1 %v3791_v12 }
 0x3da   :  { %3517 = vmatpush3.bf16.msra.mxu1 %v4037_v43 }
 0x3db   :  { %3518 = vmatprep.subr.bf16.mxu1 %v3791_v12 }
 0x4a8   :  { %v992_v58 = vpop.f32.mrb[6].mxu1 }
 0x4a9   :  { %v993_v59 = vadd.f32 %v992_v58, %v789_v57  ;;  %v3309_v61 = vpop.f32.mrb[7].mxu1 }
 0x4ab   :  { %3651 = vtanh.f32 %v993_v59 }
 0x4b5   :  { %v3652_v63 = vpop.eup %3651 }
 0x4b6   :  { %v997_v0 = vmul.f32 %v3652_v63, %v4161_v7 }
 0x4b8   :  { %v998_v1 = vadd.f32 %v4168_v60, %v997_v0 }
 0x4ba   :  { %1001 = vrot.lane.b32.xlu0 %v998_v1, %s3795_s10  ;;  %v999_v5 = vmul.f32 %v998_v1, %v910_v52  ;;  %v792_v52 = vadd.f32 %v4192_v42, %v4141_v36 }
 0x52c   :  { %v1002_v2 = vpop.permute.xlu0 %1001 }
 0x52d   :  { %v1004_v4 = vmul.f32 %v1002_v2, %v998_v1 }
 0x52f   :  { %1006 = vrot.lane.b32.xlu1 %v1004_v4, %s3796_s11 }
 0x5a1   :  { %v1007_v8 = vpop.permute.xlu1 %1006 }
 0x5a2   :  { %v1009_v9 = vadd.f32 %v1007_v8, %v999_v5  ;;  %v793_v8 = vadd.f32 %v4141_v36, %v4198_v46  ;;  %v1630_v46 = vld [vmem:[%s4675_s12] sm:$0xff] }
 0x5a4   :  { %3653 = vtanh.f32 %v1009_v9 }
 0x5ae   :  { %v3654_v10 = vpop.eup %3653 }
 0x5af   :  { %1012 = vrot.lane.b32.xlu0 %v3654_v10, %s3795_s10 }
 0x621   :  { %v1013_v11 = vpop.permute.xlu0 %1012 }
 0x622   :  { %v1015_v62 = vmul.f32 %v1013_v11, %v998_v1 }
 0x624   :  { %1017 = vrot.lane.b32.xlu1 %v1015_v62, %s3796_s11 }
 0x696   :  { %v1018_v13 = vpop.permute.xlu1 %1017 }
 0x697   :  { %1021 = vst.msk [vmem:[#allocation3 + $0x8] sm:$0xff] %vm823_vm7, %v1018_v13  ;;  %3319 = vmatmul.mubr.msk.f32.vlgmr.msra.gmra.mrb[8].mxu1 %vm823_vm7, %v1018_v13 }
 0x698   :  { %3520 = vmatpush3.bf16.msra.mxu1 %v4024_v34  ;;  %3329 = vmatprep.mubr.msk.f32.mxu1 %vm3792_vm3, %v3793_v45 }
 0x699   :  { %3521 = vmatprep.subr.bf16.mxu1 %v3791_v12 }
 0x69c   :  { %3523 = vmatpush3.bf16.msra.mxu1 %v4037_v43 }
 0x69d   :  { %3530 = vmatprep.subr.bf16.mxu1 %v3791_v12 }
 0x76a   :  { %v1092_v18 = vpop.f32.mrb[8].mxu1 }
 0x76b   :  { %v1093_v19 = vadd.f32 %v1092_v18, %v790_v14  ;;  %v3320_v20 = vpop.f32.mrb[9].mxu1 }
 0x76d   :  { %3655 = vtanh.f32 %v1093_v19  ;;  %v1631_v19 = vld [vmem:[%s4675_s12 + $0x8] sm:$0xff] }
 0x76e   :  { %v3548_v20 = vpack.c.bf16 %v1631_v19, %v1630_v46  ;;  %v4376_v46 = vld [vmem:[%s4700_s1 + $0x30] sm:$0xff] }
 0x76f   :  { %v1857_v19 = vmin.f32 %v4376_v46, 0.0  ;;  %vm1849_vm0 = vcmp.gt.f32.partialorder %v4376_v46, 0.0 }
 0x777   :  { %v3656_v17 = vpop.eup %3655 }
 0x778   :  { %v1097_v23 = vmul.f32 %v3656_v17, %v4161_v7 }
 0x77a   :  { %v1098_v6 = vadd.f32 %v4168_v60, %v1097_v23 }
 0x77c   :  { %1101 = vrot.lane.b32.xlu0 %v1098_v6, %s3795_s10  ;;  %v1099_v15 = vmul.f32 %v1098_v6, %v1009_v9 }
 0x7ee   :  { %v1102_v24 = vpop.permute.xlu0 %1101 }
 0x7ef   :  { %v1104_v26 = vmul.f32 %v1102_v24, %v1098_v6  ;;  %v1632_v24 = vld [vmem:[%s4675_s12 + $0x10] sm:$0xff] }
 0x7f1   :  { %1106 = vrot.lane.b32.xlu1 %v1104_v26, %s3796_s11  ;;  %v1633_v26 = vld [vmem:[%s4675_s12 + $0x18] sm:$0xff] }
 0x863   :  { %v1107_v3 = vpop.permute.xlu1 %1106 }
 0x864   :  { %v1109_v27 = vadd.f32 %v1107_v3, %v1099_v15  ;;  %v3552_v15 = vpack.c.bf16 %v1633_v26, %v1632_v24  ;;  %v1871_v26 = vmul.f32 1.442695, %v1857_v19 }
 0x866   :  { %3657 = vtanh.f32 %v1109_v27 }
 0x870   :  { %v3658_v28 = vpop.eup %3657 }
 0x871   :  { %1112 = vrot.lane.b32.xlu0 %v3658_v28, %s3795_s10  ;;  %v1623_v28 = vld [vmem:[#allocation3 + $0x8] sm:$0xff] }
 0x8e3   :  { %v1113_v29 = vpop.permute.xlu0 %1112 }
 0x8e4   :  { %v1115_v25 = vmul.f32 %v1113_v29, %v1098_v6 }
 0x8e6   :  { %1117 = vrot.lane.b32.xlu1 %v1115_v25, %s3796_s11 }
 0x958   :  { %v1118_v22 = vpop.permute.xlu1 %1117 }
 0x959   :  { %1121 = vst.msk [vmem:[#allocation3 + $0x10] sm:$0xff] %vm823_vm7, %v1118_v22  ;;  %3330 = vmatmul.mubr.msk.f32.vlgmr.msra.gmra.mrb[10].mxu1 %vm823_vm7, %v1118_v22 }
 0x95a   :  { %3532 = vmatpush3.bf16.msra.mxu1 %v4024_v34  ;;  %3351 = vmatprep.mubr.msk.f32.mxu1 %vm3792_vm3, %v3793_v45 }
 0x95b   :  { %3533 = vmatprep.subr.bf16.mxu1 %v3791_v12 }
 0x95e   :  { %3535 = vmatpush3.bf16.msra.mxu1 %v4037_v43 }
 0x95f   :  { %3542 = vmatprep.subr.bf16.mxu1 %v3791_v12 }
 0x960   :  { %v1624_v29 = vld [vmem:[#allocation3 + $0x10] sm:$0xff] }
 0xa2c   :  { %v1192_v31 = vpop.f32.mrb[10].mxu1 }
 0xa2d   :  { %v1193_v32 = vadd.f32 %v1192_v31, %v791_v21  ;;  %v3331_v38 = vpop.f32.mrb[11].mxu1  ;;  %v794_v31 = vadd.f32 %v4196_v44, %v4141_v36 }
 0xa2f   :  { %3659 = vtanh.f32 %v1193_v32 }
 0xa39   :  { %v3660_v16 = vpop.eup %3659 }
 0xa3a   :  { %v1197_v39 = vmul.f32 %v3660_v16, %v4161_v7 }
 0xa3c   :  { %v1198_v37 = vadd.f32 %v4168_v60, %v1197_v39 }
 0xa3e   :  { %1201 = vrot.lane.b32.xlu0 %v1198_v37, %s3795_s10  ;;  %v1199_v35 = vmul.f32 %v1198_v37, %v1109_v27  ;;  %v1622_v27 = vld [vmem:[#allocation3] sm:$0xff] }
 0xab0   :  { %v1202_v40 = vpop.permute.xlu0 %1201 }
 0xab1   :  { %v1204_v33 = vmul.f32 %v1202_v40, %v1198_v37 }
 0xab3   :  { %1206 = vrot.lane.b32.xlu1 %v1204_v33, %s3796_s11 }
 0xb25   :  { %v1207_v41 = vpop.permute.xlu1 %1206 }
 0xb26   :  { %v1209_v47 = vadd.f32 %v1207_v41, %v1199_v35 }
 0xb28   :  { %3661 = vtanh.f32 %v1209_v47 }
 0xb32   :  { %v3662_v30 = vpop.eup %3661 }
 0xb33   :  { %1212 = vrot.lane.b32.xlu0 %v3662_v30, %s3795_s10 }
 0xba5   :  { %v1213_v48 = vpop.permute.xlu0 %1212 }
 0xba6   :  { %v1215_v50 = vmul.f32 %v1213_v48, %v1198_v37 }
 0xba8   :  { %1217 = vrot.lane.b32.xlu1 %v1215_v50, %s3796_s11 }
 0xc1a   :  { %v1218_v51 = vpop.permute.xlu1 %1217 }
 0xc1b   :  { %1221 = vst.msk [vmem:[#allocation3 + $0x18] sm:$0xff] %vm823_vm7, %v1218_v51  ;;  %3341 = vmatmul.mubr.msk.f32.vlgmr.msra.gmra.mrb[22].mxu0 %vm823_vm7, %v1218_v51 }
 0xc1c   :  { %3538 = vmatpush3.bf16.msra.mxu0 %v4024_v34  ;;  %3362 = vmatprep.mubr.msk.f32.mxu0 %vm3792_vm3, %v3793_v45 }
 0xc1d   :  { %3539 = vmatprep.subr.bf16.mxu0 %v3791_v12 }
 0xc20   :  { %3541 = vmatpush3.bf16.msra.mxu0 %v4037_v43 }
 0xc21   :  { %3549 = vmatprep.subr.bf16.mxu0 %v3548_v20 }
 0xc22   :  { %v1625_v25 = vld [vmem:[#allocation3 + $0x18] sm:$0xff] }
 0xcee   :  { %v1292_v53 = vpop.f32.mrb[22].mxu0 }
 0xcef   :  { %v1293_v54 = vadd.f32 %v1292_v53, %v792_v52  ;;  %v3342_v55 = vpop.f32.mrb[23].mxu0 }
 0xcf1   :  { %3663 = vtanh.f32 %v1293_v54 }
 0xcfb   :  { %v3664_v56 = vpop.eup %3663 }
 0xcfc   :  { %v1297_v57 = vmul.f32 %v3664_v56, %v4161_v7 }
 0xcfe   :  { %v1298_v58 = vadd.f32 %v4168_v60, %v1297_v57 }
 0xd00   :  { %1301 = vrot.lane.b32.xlu0 %v1298_v58, %s3795_s10  ;;  %v1299_v63 = vmul.f32 %v1298_v58, %v1209_v47 }
 0xd72   :  { %v1302_v59 = vpop.permute.xlu0 %1301 }
 0xd73   :  { %v1304_v61 = vmul.f32 %v1302_v59, %v1298_v58  ;;  %v795_v59 = vadd.f32 %v4141_v36, %v4200_v49  ;;  %v4341_v36 = vld [vmem:[%s4700_s1 + $0x8] sm:$0xff] }
 0xd74   :  { %v1852_v49 = vmin.f32 %v4341_v36, 0.0  ;;  %vm1844_vm11 = vcmp.gt.f32.partialorder %v4341_v36, 0.0 }
 0xd75   :  { %1306 = vrot.lane.b32.xlu1 %v1304_v61, %s3796_s11 }
 0xde7   :  { %v1307_v0 = vpop.permute.xlu1 %1306 }
 0xde8   :  { %v1309_v1 = vadd.f32 %v1307_v0, %v1299_v63 }
 0xdea   :  { %3665 = vtanh.f32 %v1309_v1 }
 0xdf4   :  { %v3666_v42 = vpop.eup %3665 }
 0xdf5   :  { %1312 = vrot.lane.b32.xlu0 %v3666_v42, %s3795_s10  ;;  %v4334_v42 = vld [vmem:[%s4700_s1] sm:$0xff] }
 0xdf6   :  { %vm1843_vm9 = vcmp.gt.f32.partialorder %v4334_v42, 0.0 }
 0xe67   :  { %v1313_v2 = vpop.permute.xlu0 %1312 }
 0xe68   :  { %v1315_v4 = vmul.f32 %v1313_v2, %v1298_v58  ;;  %v1851_v2 = vmin.f32 %v4334_v42, 0.0 }
 0xe6a   :  { %1317 = vrot.lane.b32.xlu1 %v1315_v4, %s3796_s11  ;;  %v4347_v4 = vld [vmem:[%s4700_s1 + $0x10] sm:$0xff] }
 0xe6b   :  { %vm1845_vm12 = vcmp.gt.f32.partialorder %v4347_v4, 0.0 }
 0xedc   :  { %v1318_v5 = vpop.permute.xlu1 %1317 }
 0xedd   :  { %1321 = vst.msk [vmem:[#allocation3 + $0x20] sm:$0xff] %vm823_vm7, %v1318_v5  ;;  %3352 = vmatmul.mubr.msk.f32.vlgmr.msra.gmra.mrb[12].mxu1 %vm823_vm7, %v1318_v5  ;;  %v1853_v5 = vmin.f32 %v4347_v4, 0.0 }
 0xede   :  { %3544 = vmatpush3.bf16.msra.mxu1 %v4024_v34  ;;  %3373 = vmatprep.mubr.msk.f32.mxu1 %vm3792_vm3, %v3793_v45 }
 0xedf   :  { %3545 = vmatprep.subr.bf16.mxu1 %v3791_v12 }
 0xee2   :  { %3547 = vmatpush3.bf16.msra.mxu1 %v4037_v43 }
 0xee4   :  { %v1626_v22 = vld [vmem:[#allocation3 + $0x20] sm:$0xff] }
 0xfb0   :  { %v1392_v9 = vpop.f32.mrb[12].mxu1 }
 0xfb1   :  { %v1393_v10 = vadd.f32 %v1392_v9, %v793_v8  ;;  %v3353_v11 = vpop.f32.mrb[13].mxu1  ;;  %v1842_v8 = vld [vmem:[%s4677_s14] sm:$0x7]  ;;  %v1859_v9 = vmul.f32 1.442695, %v1851_v2  ;;  %v2152_v2 = vsub.f32 0.0, %v4347_v4 }
 0xfb3   :  { %3667 = vtanh.f32 %v1393_v10  ;;  %v4357_v10 = vld [vmem:[%s4700_s1 + $0x18] sm:$0xff]  ;;  %vm2160_vm6 = vcmp.gt.f32.partialorder %v2152_v2, 0.0 }
 0xfb4   :  { %v1854_v11 = vmin.f32 %v4357_v10, 0.0  ;;  %vm1846_vm13 = vcmp.gt.f32.partialorder %v4357_v10, 0.0 }
 0xfbd   :  { %v3668_v62 = vpop.eup %3667 }
 0xfbe   :  { %v1397_v13 = vmul.f32 %v3668_v62, %v4161_v7  ;;  %v1861_v62 = vmul.f32 1.442695, %v1852_v49 }
 0xfc0   :  { %v1398_v14 = vadd.f32 %v4168_v60, %v1397_v13  ;;  %v1863_v13 = vmul.f32 1.442695, %v1853_v5  ;;  %v2153_v5 = vsub.f32 0.0, %v4357_v10 }
 0xfc2   :  { %1401 = vrot.lane.b32.xlu0 %v1398_v14, %s3795_s10  ;;  %v1399_v12 = vmul.f32 %v1398_v14, %v1309_v1  ;;  %v1891_v1 = vld [vmem:[%s4678_s15] sm:$0x7] }
 0xfc3   :  { %3396 = vmatprep.subr.msk.mxu1 %vm1917_vm8, %v1891_v1 }
0x1034   :  { %v1402_v34 = vpop.permute.xlu0 %1401 }
0x1035   :  { %v1404_v45 = vmul.f32 %v1402_v34, %v1398_v14 }
0x1037   :  { %1406 = vrot.lane.b32.xlu1 %v1404_v45, %s3796_s11  ;;  %v1865_v45 = vmul.f32 1.442695, %v1854_v11 }
0x10a9   :  { %v1407_v43 = vpop.permute.xlu1 %1406 }
0x10aa   :  { %v1409_v18 = vadd.f32 %v1407_v43, %v1399_v12  ;;  %v4370_v12 = vld [vmem:[%s4700_s1 + $0x28] sm:$0xff] }
0x10ab   :  { %v1856_v43 = vmin.f32 %v4370_v12, 0.0  ;;  %vm1848_vm15 = vcmp.gt.f32.partialorder %v4370_v12, 0.0 }
0x10ac   :  { %3669 = vtanh.f32 %v1409_v18 }
0x10b6   :  { %v3670_v17 = vpop.eup %3669 }
0x10b7   :  { %1412 = vrot.lane.b32.xlu0 %v3670_v17, %s3795_s10  ;;  %v1869_v17 = vmul.f32 1.442695, %v1856_v43 }
0x1129   :  { %v1413_v23 = vpop.permute.xlu0 %1412 }
0x112a   :  { %v1415_v6 = vmul.f32 %v1413_v23, %v1398_v14  ;;  %v4363_v14 = vld [vmem:[%s4700_s1 + $0x20] sm:$0xff]  ;;  %v4382_v23 = vld [vmem:[%s4700_s1 + $0x38] sm:$0xff] }
0x112b   :  { %v1855_v34 = vmin.f32 %v4363_v14, 0.0  ;;  %vm1847_vm14 = vcmp.gt.f32.partialorder %v4363_v14, 0.0  ;;  %vm1850_vm1 = vcmp.gt.f32.partialorder %v4382_v23, 0.0 }
0x112c   :  { %1417 = vrot.lane.b32.xlu1 %v1415_v6, %s3796_s11  ;;  %v1858_v6 = vmin.f32 %v4382_v23, 0.0 }
0x119e   :  { %v1418_v3 = vpop.permute.xlu1 %1417 }
0x119f   :  { %1421 = vst.msk [vmem:[#allocation3 + $0x28] sm:$0xff] %vm823_vm7, %v1418_v3  ;;  %3363 = vmatmul.mubr.msk.f32.vlgmr.msra.gmra.mrb[24].mxu0 %vm823_vm7, %v1418_v3 }
0x11a0   :  { %3551 = vmatpush3.bf16.msra.mxu0 %v3548_v20  ;;  %3384 = vmatprep.mubr.msk.f32.mxu0 %vm823_vm7, %v1622_v27 }
0x11a1   :  { %3553 = vmatprep.subr.bf16.mxu0 %v3552_v15 }
0x11a4   :  { %3555 = vmatpush3.bf16.msra.mxu0 %v3552_v15  ;;  %v1873_v15 = vmul.f32 1.442695, %v1858_v6 }
0x11a6   :  { %v1627_v21 = vld [vmem:[#allocation3 + $0x28] sm:$0xff] }
0x11a7   :  { %3385 = vmatmul.mubr.msk.f32.vlgmr.msra.gmra.mrb[26].mxu0 %vm823_vm7, %v1623_v28 }
0x11a8   :  { %3387 = vmatprep.mubr.msk.f32.mxu0 %vm823_vm7, %v1624_v29 }
0x11ab   :  { %3388 = vmatmul.mubr.msk.f32.gmra.mrb[28].mxu0 %vm823_vm7, %v1625_v25 }
0x11ac   :  { %3390 = vmatprep.mubr.msk.f32.mxu0 %vm823_vm7, %v1626_v22 }
0x11af   :  { %3391 = vmatmul.mubr.msk.f32.gmra.mrb[30].mxu0 %vm823_vm7, %v1627_v21 }
0x1272   :  { %v1492_v32 = vpop.f32.mrb[24].mxu0 }
0x1273   :  { %v1493_v38 = vadd.f32 %v1492_v32, %v794_v31  ;;  %v3364_v16 = vpop.f32.mrb[25].mxu0 }
0x1275   :  { %3671 = vtanh.f32 %v1493_v38 }
0x127a   :  { %v4302_v39 = vpop.f32.mrb[26].mxu0 }
0x127b   :  { %v4304_v37 = vpop.f32.mrb[27].mxu0 }
0x127e   :  { %v4306_v40 = vpop.f32.mrb[28].mxu0 }
0x127f   :  { %v3672_v33 = vpop.eup %3671  ;;  %v4308_v35 = vpop.f32.mrb[29].mxu0 }
0x1280   :  { %v1497_v41 = vmul.f32 %v3672_v33, %v4161_v7 }
0x1282   :  { %v4311_v47 = vpop.f32.mrb[30].mxu0  ;;  %v1498_v30 = vadd.f32 %v4168_v60, %v1497_v41 }
0x1283   :  { %v4314_v44 = vpop.f32.mrb[31].mxu0 }
0x1284   :  { %1501 = vrot.lane.b32.xlu0 %v1498_v30, %s3795_s10  ;;  %v1499_v51 = vmul.f32 %v1498_v30, %v1409_v18  ;;  %v1867_v18 = vmul.f32 1.442695, %v1855_v34 }
0x12f6   :  { %v1502_v48 = vpop.permute.xlu0 %1501 }
0x12f7   :  { %v1504_v50 = vmul.f32 %v1502_v48, %v1498_v30 }
0x12f9   :  { %1506 = vrot.lane.b32.xlu1 %v1504_v50, %s3796_s11 }
0x136b   :  { %v1507_v52 = vpop.permute.xlu1 %1506 }
0x136c   :  { %v4318_v53 = vadd.f32 %v1507_v52, %v1499_v51 }
0x136e   :  { %3673 = vtanh.f32 %v4318_v53 }
0x1378   :  { %v3674_v54 = vpop.eup %3673 }
0x1379   :  { %1512 = vrot.lane.b32.xlu0 %v3674_v54, %s3795_s10 }
0x13eb   :  { %v1513_v55 = vpop.permute.xlu0 %1512 }
0x13ec   :  { %v1515_v56 = vmul.f32 %v1513_v55, %v1498_v30 }
0x13ee   :  { %1517 = vrot.lane.b32.xlu1 %v1515_v56, %s3796_s11 }
0x1460   :  { %v1518_v57 = vpop.permute.xlu1 %1517 }
0x1461   :  { %1521 = vst.msk [vmem:[#allocation3 + $0x30] sm:$0xff] %vm823_vm7, %v1518_v57  ;;  %3374 = vmatmul.mubr.msk.f32.vlgmr.msra.gmra.mrb[14].mxu1 %vm823_vm7, %v1518_v57 }
0x1462   :  { %3397 = vmatpush3.msk.msra.mxu1 %vm1917_vm8, %v1891_v1 }
0x1463   :  { %3410 = vmatprep.subr.msk.mxu1 %vm1917_vm8, %v1842_v8 }
0x1468   :  { %v1628_v58 = vld [vmem:[#allocation3 + $0x30] sm:$0xff] }
0x1469   :  { %3393 = vmatprep.mubr.msk.f32.mxu0 %vm823_vm7, %v1628_v58 }
0x1534   :  { %v1592_v61 = vpop.f32.mrb[14].mxu1 }
0x1535   :  { %v1593_v63 = vadd.f32 %v1592_v61, %v795_v59  ;;  %v3375_v0 = vpop.f32.mrb[15].mxu1  ;;  %v2150_v59 = vsub.f32 0.0, %v4334_v42  ;;  %v2151_v61 = vsub.f32 0.0, %v4341_v36 }
0x1537   :  { %3675 = vtanh.f32 %v1593_v63  ;;  %v2166_v63 = vmin.f32 %v2150_v59, 0.0  ;;  %v2167_v0 = vmin.f32 %v2151_v61, 0.0  ;;  %vm2158_vm3 = vcmp.gt.f32.partialorder %v2150_v59, 0.0 }
0x1538   :  { %3677 = vpow2.f32 %v1859_v9  ;;  %v2169_v9 = vmin.f32 %v2153_v5, 0.0  ;;  %vm2159_vm5 = vcmp.gt.f32.partialorder %v2151_v61, 0.0 }
0x1539   :  { %3679 = vpow2.f32 %v1861_v62  ;;  %v2174_v1 = vmul.f32 1.442695, %v2166_v63  ;;  %v2176_v49 = vmul.f32 1.442695, %v2167_v0  ;;  %v2154_v62 = vsub.f32 0.0, %v4363_v14 }
0x153a   :  { %3681 = vpow2.f32 %v1863_v13  ;;  %v2180_v13 = vmul.f32 1.442695, %v2169_v9 }
0x153b   :  { %3683 = vpow2.f32 %v1865_v45 }
0x153c   :  { %3685 = vpow2.f32 %v1867_v18 }
0x153d   :  { %3687 = vpow2.f32 %v1869_v17 }
0x153e   :  { %3689 = vpow2.f32 %v1871_v26 }
0x153f   :  { %3691 = vpow2.f32 %v1873_v15 }
0x1540   :  { %3693 = vpow2.f32 %v2174_v1 }
0x1541   :  { %v3676_v20 = vpop.eup %3675  ;;  %3695 = vpow2.f32 %v2176_v49 }
0x1542   :  { %v1597_v24 = vmul.f32 %v3676_v20, %v4161_v7  ;;  %v3678_v27 = vpop.eup %3677 }
0x1543   :  { %v3680_v28 = vpop.eup %3679  ;;  %v3008_v29 = vadd.f32 -1.0, %v3678_v27 }
0x1544   :  { %v4387_v3 = vadd.f32 %v4168_v60, %v1597_v24  ;;  %v3682_v7 = vpop.eup %3681  ;;  %v3009_v25 = vadd.f32 -1.0, %v3680_v28  ;;  %v2206_v24 = vld [vmem:[%s4679_s16] sm:$0x7] }
0x1545   :  { %v3684_v60 = vpop.eup %3683  ;;  %v1883_v22 = vsel %vm1843_vm9, %v4334_v42, %v3008_v29  ;;  %v3010_v21 = vadd.f32 -1.0, %v3682_v7  ;;  %vm2161_vm9 = vcmp.gt.f32.partialorder %v2153_v5, 0.0 }
0x1546   :  { %1601 = vrot.lane.b32.xlu0 %v4387_v3, %s3795_s10  ;;  %v3686_v31 = vpop.eup %3685  ;;  %3398 = vmatprep.mubr.msk.f32.mxu1 %vm1892_vm10, %v1883_v22  ;;  %v1884_v32 = vsel %vm1844_vm11, %v4341_v36, %v3009_v25  ;;  %v3011_v38 = vadd.f32 -1.0, %v3684_v60 }
0x1547   :  { %v3688_v16 = vpop.eup %3687  ;;  %3399 = vmatmul.mubr.msk.f32.vlgmr.msra.gmra.mrb[16].mxu1 %vm1892_vm10, %v1884_v32  ;;  %v1885_v33 = vsel %vm1845_vm12, %v4347_v4, %v3010_v21  ;;  %v3012_v41 = vadd.f32 -1.0, %v3686_v31 }
0x1548   :  { %v3690_v30 = vpop.eup %3689  ;;  %3401 = vmatprep.mubr.msk.f32.mxu1 %vm1892_vm10, %v1885_v33  ;;  %v1886_v48 = vsel %vm1846_vm13, %v4357_v10, %v3011_v38  ;;  %v3013_v50 = vadd.f32 -1.0, %v3688_v16  ;;  %3411 = vmatpush3.msk.msra.mxu1 %vm1917_vm8, %v1842_v8  ;;  %v2168_v8 = vmin.f32 %v2152_v2, 0.0 }
0x1549   :  { %v3692_v51 = vpop.eup %3691  ;;  %v1887_v52 = vsel %vm1847_vm14, %v4363_v14, %v3012_v41  ;;  %v3014_v54 = vadd.f32 -1.0, %v3690_v30  ;;  %3424 = vmatprep.subr.msk.mxu1 %vm1917_vm8, %v2206_v24 }
0x154a   :  { %v1888_v55 = vsel %vm1848_vm15, %v4370_v12, %v3013_v50  ;;  %v3015_v56 = vadd.f32 -1.0, %v3692_v51  ;;  %v2178_v11 = vmul.f32 1.442695, %v2168_v8 }
0x154b   :  { %3402 = vmatmul.mubr.msk.f32.gmra.mrb[18].mxu1 %vm1892_vm10, %v1886_v48  ;;  %v1889_v57 = vsel %vm1849_vm0, %v4376_v46, %v3014_v54  ;;  %v1599_v54 = vmul.f32 %v4387_v3, %v4318_v53  ;;  %v2437_v53 = vld [vmem:[%s4682_s19 + $0x8] sm:$0x1] }
0x154c   :  { %3404 = vmatprep.mubr.msk.f32.mxu1 %vm1892_vm10, %v1887_v52  ;;  %v1890_v58 = vsel %vm1850_vm1, %v4382_v23, %v3015_v56  ;;  %3697 = vpow2.f32 %v2178_v11 }
0x154d   :  { %3699 = vpow2.f32 %v2180_v13  ;;  %v2435_v13 = vld [vmem:[%s4681_s18 + $0x8] sm:$0xff] }
0x154f   :  { %3405 = vmatmul.mubr.msk.f32.gmra.mrb[20].mxu1 %vm1892_vm10, %v1888_v55 }
0x1550   :  { %3407 = vmatprep.mubr.msk.f32.mxu1 %vm1892_vm10, %v1889_v57 }
0x1553   :  { %3408 = vmatmul.mubr.msk.f32.gmra.mrb[22].mxu1 %vm1892_vm10, %v1890_v58 }
0x1554   :  { %3412 = vmatprep.mubr.msk.f32.mxu1 %vm1892_vm10, %v4334_v42  ;;  %v2155_v42 = vsub.f32 0.0, %v4370_v12 }
0x1556   :  { %v2171_v34 = vmin.f32 %v2155_v42, 0.0  ;;  %vm2163_vm11 = vcmp.gt.f32.partialorder %v2155_v42, 0.0 }
0x1557   :  { %3413 = vmatmul.mubr.msk.f32.vlgmr.msra.gmra.mrb[16].mxu1 %vm1892_vm10, %v4341_v36  ;;  %v2170_v36 = vmin.f32 %v2154_v62, 0.0 }
0x1558   :  { %3415 = vmatprep.mubr.msk.f32.mxu1 %vm1892_vm10, %v4347_v4  ;;  %v2156_v4 = vsub.f32 0.0, %v4376_v46  ;;  %v2184_v43 = vmul.f32 1.442695, %v2171_v34  ;;  %3425 = vmatpush3.msk.msra.mxu1 %vm1917_vm8, %v2206_v24  ;;  %vm2162_vm8 = vcmp.gt.f32.partialorder %v2154_v62, 0.0 }
0x1559   :  { %v2182_v45 = vmul.f32 1.442695, %v2170_v36  ;;  %v3051_v36 = vld [vmem:[%s4680_s17] ss:$0 sm:$0xff] }
0x155a   :  { %v2172_v19 = vmin.f32 %v2156_v4, 0.0  ;;  %vm2164_vm12 = vcmp.gt.f32.partialorder %v2156_v4, 0.0 }
0x155b   :  { %3416 = vmatmul.mubr.msk.f32.gmra.mrb[18].mxu1 %vm1892_vm10, %v4357_v10  ;;  %v2157_v10 = vsub.f32 0.0, %v4382_v23  ;;  %3701 = vpow2.f32 %v2182_v45 }
0x155c   :  { %3418 = vmatprep.mubr.msk.f32.mxu1 %vm1892_vm10, %v4363_v14  ;;  %3703 = vpow2.f32 %v2184_v43  ;;  %v3694_v14 = vpop.eup %3693  ;;  %v2186_v17 = vmul.f32 1.442695, %v2172_v19 }
0x155d   :  { %v2173_v6 = vmin.f32 %v2157_v10, 0.0  ;;  %vm2165_vm13 = vcmp.gt.f32.partialorder %v2157_v10, 0.0 }
0x155e   :  { %3705 = vpow2.f32 %v2186_v17 }
0x155f   :  { %3419 = vmatmul.mubr.msk.f32.gmra.mrb[20].mxu1 %vm1892_vm10, %v4370_v12  ;;  %v3696_v12 = vpop.eup %3695  ;;  %v2188_v28 = vmul.f32 1.442695, %v2173_v6 }
0x1560   :  { %3421 = vmatprep.mubr.msk.f32.mxu1 %vm1892_vm10, %v4376_v46  ;;  %v3034_v46 = vadd.f32 -1.0, %v3694_v14  ;;  %v3698_v15 = vpop.eup %3697 }
0x1561   :  { %v3700_v29 = vpop.eup %3699  ;;  %v3036_v7 = vadd.f32 -1.0, %v3698_v15  ;;  %3707 = vpow2.f32 %v2188_v28 }
0x1562   :  { %v2198_v26 = vsel %vm2158_vm3, %v2150_v59, %v3034_v46  ;;  %v3037_v25 = vadd.f32 -1.0, %v3700_v29 }
0x1563   :  { %3422 = vmatmul.mubr.msk.f32.gmra.mrb[22].mxu1 %vm1892_vm10, %v4382_v23  ;;  %v3035_v23 = vadd.f32 -1.0, %v3696_v12  ;;  %v2200_v60 = vsel %vm2160_vm6, %v2152_v2, %v3036_v7 }
0x1564   :  { %3426 = vmatprep.mubr.msk.f32.mxu1 %vm1892_vm10, %v2198_v26  ;;  %v2201_v21 = vsel %vm2161_vm9, %v2153_v5, %v3037_v25  ;;  %v2436_v5 = vld [vmem:[%s4682_s19] sm:$0xff] }
0x1565   :  { %v2199_v27 = vsel %vm2159_vm5, %v2151_v61, %v3035_v23  ;;  %v3702_v22 = vpop.eup %3701  ;;  %v3556_v8 = vpack.c.bf16 %v2437_v53, %v2436_v5  ;;  %v4505_v26 = vld [vmem:[%s4676_s13] ss:$0 sm:$0xff] }
0x1566   :  { %v3704_v31 = vpop.eup %3703  ;;  %v3038_v32 = vadd.f32 -1.0, %v3702_v22 }
0x1567   :  { %3427 = vmatmul.mubr.msk.f32.vlgmr.msra.gmra.mrb[16].mxu1 %vm1892_vm10, %v2199_v27  ;;  %v3039_v38 = vadd.f32 -1.0, %v3704_v31  ;;  %v4522_v31 = vadd.f32 %v4505_v26, %v4304_v37 }
0x1568   :  { %3429 = vmatprep.mubr.msk.f32.mxu1 %vm1892_vm10, %v2200_v60  ;;  %v2202_v16 = vsel %vm2162_vm8, %v2154_v62, %v3038_v32  ;;  %v3706_v41 = vpop.eup %3705  ;;  %v2434_v62 = vld [vmem:[%s4681_s18] sm:$0xff] }
0x1569   :  { %v2203_v33 = vsel %vm2163_vm11, %v2155_v42, %v3039_v38  ;;  %v3040_v30 = vadd.f32 -1.0, %v3706_v41  ;;  %v4473_v42 = vpack.c.bf16 %v2435_v13, %v2434_v62  ;;  %v1778_v37 = vmul.f32 0.044715, %v4522_v31 }
0x156b   :  { %3430 = vmatmul.mubr.msk.f32.gmra.mrb[18].mxu1 %vm1892_vm10, %v2201_v21  ;;  %v3708_v48 = vpop.eup %3707  ;;  %v2204_v50 = vsel %vm2164_vm12, %v2156_v4, %v3040_v30  ;;  %v4518_v21 = vadd.f32 %v4302_v39, %v4505_v26 }
0x156c   :  { %3432 = vmatprep.mubr.msk.f32.mxu1 %vm1892_vm10, %v2202_v16  ;;  %v3041_v51 = vadd.f32 -1.0, %v3708_v48 }
0x156e   :  { %v2205_v52 = vsel %vm2165_vm13, %v2157_v10, %v3041_v51  ;;  %v4535_v51 = vadd.f32 %v4306_v40, %v4505_v26 }
0x156f   :  { %3433 = vmatmul.mubr.msk.f32.gmra.mrb[20].mxu1 %vm1892_vm10, %v2203_v33 }
0x1570   :  { %3435 = vmatprep.mubr.msk.f32.mxu1 %vm1892_vm10, %v2204_v50  ;;  %v1779_v50 = vmul.f32 0.044715, %v4518_v21  ;;  %v1781_v5 = vmul.f32 0.044715, %v4535_v51 }
0x1572   :  { %v1787_v40 = vmul.f32 %v1779_v50, %v4518_v21 }
0x1573   :  { %3436 = vmatmul.mubr.msk.f32.gmra.mrb[22].mxu1 %vm1892_vm10, %v2205_v52  ;;  %vm2463_vm10 = vcmask 1040384   ;;  %v4539_v52 = vadd.f32 %v4505_v26, %v4308_v35 }
0x1574   :  { %vm3557_vm14 = vmpackc.low %vm2463_vm10, %vm3794_vm4  ;;  %v1795_v13 = vmul.f32 %v1787_v40, %v4518_v21  ;;  %vm2438_vm4 = vcmask 72704  }
0x1575   :  { %3558 = vmatprep.subr.msk.bf16.mxu0 %vm3557_vm14, %v3556_v8  ;;  %v1780_v35 = vmul.f32 0.044715, %v4539_v52 }
0x1576   :  { %3561 = vmatpush3.bf16.msk.msra.mxu0 %vm3557_vm14, %v3556_v8 }
0x1577   :  { %3563 = vmatprep.subr.bf16.mxu0 %v4473_v42 }
0x15b8   :  { %v1602_v18 = vpop.permute.xlu0 %1601 }
0x15b9   :  { %v1604_v20 = vmul.f32 %v1602_v18, %v4387_v3 }
0x15bb   :  { %1606 = vrot.lane.b32.xlu1 %v1604_v20, %s3796_s11 }
0x162d   :  { %v1607_v55 = vpop.permute.xlu1 %1606 }
0x162e   :  { %v1609_v56 = vadd.f32 %v1607_v55, %v1599_v54 }
0x1630   :  { %3709 = vtanh.f32 %v1609_v56 }
0x163a   :  { %v3710_v57 = vpop.eup %3709  ;;  %v3428_v58 = vpop.f32.mrb[16].mxu1 }
0x163b   :  { %1612 = vrot.lane.b32.xlu0 %v3710_v57, %s3795_s10  ;;  %v2300_v59 = vpop.f32.mrb[17].mxu1 }
0x163c   :  { %v4479_v34 = vadd.f32 %v3051_v36, %v2300_v59 }
0x163e   :  { %v3431_v61 = vpop.f32.mrb[18].mxu1  ;;  %v2370_v45 = vmul.f32 0.044715, %v4479_v34 }
0x163f   :  { %v2310_v63 = vpop.f32.mrb[19].mxu1  ;;  %v4487_v10 = vadd.f32 %v3431_v61, %v3051_v36 }
0x1640   :  { %v4484_v4 = vadd.f32 %v3051_v36, %v2310_v63  ;;  %v2378_v18 = vmul.f32 %v2370_v45, %v4479_v34  ;;  %v1786_v63 = vmul.f32 %v1778_v37, %v4522_v31 }
0x1641   :  { %v2373_v17 = vmul.f32 0.044715, %v4487_v10 }
0x1642   :  { %v3434_v0 = vpop.f32.mrb[20].mxu1  ;;  %v2372_v19 = vmul.f32 0.044715, %v4484_v4  ;;  %v2386_v12 = vmul.f32 %v2378_v18, %v4479_v34 }
0x1643   :  { %v2320_v1 = vpop.f32.mrb[21].mxu1  ;;  %v4495_v6 = vadd.f32 %v3434_v0, %v3051_v36  ;;  %v2381_v27 = vmul.f32 %v2373_v17, %v4487_v10  ;;  %v4551_v0 = vadd.f32 %v4505_v26, %v4314_v44  ;;  %v1788_v44 = vmul.f32 %v1780_v35, %v4539_v52 }
0x1644   :  { %v4491_v20 = vadd.f32 %v3051_v36, %v2320_v1  ;;  %v2380_v24 = vmul.f32 %v2372_v19, %v4484_v4  ;;  %v2394_v7 = vadd.f32 %v2386_v12, %v4479_v34 }
0x1645   :  { %v2375_v28 = vmul.f32 0.044715, %v4495_v6  ;;  %v2389_v38 = vmul.f32 %v2381_v27, %v4487_v10  ;;  %v1782_v62 = vmul.f32 0.044715, %v4551_v0  ;;  %v1796_v17 = vmul.f32 %v1788_v44, %v4539_v52 }
0x1646   :  { %v3437_v2 = vpop.f32.mrb[22].mxu1  ;;  %v2374_v46 = vmul.f32 0.044715, %v4491_v20  ;;  %v2388_v25 = vmul.f32 %v2380_v24, %v4484_v4  ;;  %v2402_v39 = vmul.f32 0.7978846, %v2394_v7  ;;  %v1803_v24 = vadd.f32 %v1795_v13, %v4518_v21 }
0x1647   :  { %v2330_v49 = vpop.f32.mrb[23].mxu1  ;;  %v4510_v29 = vadd.f32 %v3437_v2, %v3051_v36  ;;  %v2383_v16 = vmul.f32 %v2375_v28, %v4495_v6  ;;  %v2397_v55 = vadd.f32 %v2389_v38, %v4487_v10  ;;  %v1790_v12 = vmul.f32 %v1782_v62, %v4551_v0 }
0x1648   :  { %v4500_v23 = vadd.f32 %v3051_v36, %v2330_v49  ;;  %v2382_v60 = vmul.f32 %v2374_v46, %v4491_v20  ;;  %v2396_v41 = vadd.f32 %v2388_v25, %v4484_v4  ;;  %3711 = vtanh.f32 %v2402_v39 }
0x1649   :  { %v2377_v33 = vmul.f32 0.044715, %v4510_v29  ;;  %v2391_v56 = vmul.f32 %v2383_v16, %v4495_v6  ;;  %v2405_v49 = vmul.f32 0.7978846, %v2397_v55  ;;  %v2362_v25 = vmul.f32 0.5, %v4479_v34 }
0x164a   :  { %v2376_v22 = vmul.f32 0.044715, %v4500_v23  ;;  %v2390_v30 = vmul.f32 %v2382_v60, %v4491_v20  ;;  %v2404_v61 = vmul.f32 0.7978846, %v2396_v41  ;;  %v1798_v38 = vmul.f32 %v1790_v12, %v4551_v0 }
0x164b   :  { %v2385_v57 = vmul.f32 %v2377_v33, %v4510_v29  ;;  %v2399_v1 = vadd.f32 %v2391_v56, %v4495_v6  ;;  %v1811_v33 = vmul.f32 0.7978846, %v1803_v24  ;;  %v2364_v34 = vmul.f32 0.5, %v4484_v4 }
0x164c   :  { %v2384_v48 = vmul.f32 %v2376_v22, %v4500_v23  ;;  %v1806_v56 = vadd.f32 %v1798_v38, %v4551_v0  ;;  %v2368_v62 = vmul.f32 0.5, %v4500_v23 }
0x164d   :  { %v2393_v2 = vmul.f32 %v2385_v57, %v4510_v29  ;;  %v2407_v45 = vmul.f32 0.7978846, %v2399_v1  ;;  %v2366_v1 = vmul.f32 0.5, %v4491_v20 }
0x164e   :  { %v2392_v59 = vmul.f32 %v2384_v48, %v4500_v23 }
0x1650   :  { %v2400_v53 = vadd.f32 %v2392_v59, %v4500_v23 }
0x1652   :  { %v2408_v18 = vmul.f32 0.7978846, %v2400_v53 }
0x16ad   :  { %v1613_v9 = vpop.permute.xlu0 %1612 }
0x16ae   :  { %v1615_v11 = vmul.f32 %v1613_v9, %v4387_v3  ;;  %v4481_v3 = vadd.f32 %v3428_v58, %v3051_v36  ;;  %v2398_v58 = vadd.f32 %v2390_v30, %v4491_v20  ;;  %v4559_v9 = vadd.f32 %v4311_v47, %v4505_v26  ;;  %v3712_v47 = vpop.eup %3711 }
0x16af   :  { %v2401_v36 = vadd.f32 %v2393_v2, %v4510_v29  ;;  %v2418_v60 = vadd.f32 1.0, %v3712_v47 }
0x16b0   :  { %1617 = vrot.lane.b32.xlu1 %v1615_v11, %s3796_s11  ;;  %v2371_v43 = vmul.f32 0.044715, %v4481_v3  ;;  %v2406_v8 = vmul.f32 0.7978846, %v2398_v58  ;;  %v1794_v11 = vmul.f32 %v1786_v63, %v4522_v31  ;;  %v1783_v19 = vmul.f32 0.044715, %v4559_v9 }
0x16b1   :  { %v2363_v30 = vmul.f32 0.5, %v4481_v3  ;;  %v2426_v37 = vmul.f32 %v2418_v60, %v2362_v25 }
0x16b2   :  { %v2379_v14 = vmul.f32 %v2371_v43, %v4481_v3  ;;  %v1789_v43 = vmul.f32 %v1781_v5, %v4535_v51  ;;  %v1791_v7 = vmul.f32 %v1783_v19, %v4559_v9  ;;  %v1814_v5 = vmul.f32 0.7978846, %v1806_v56 }
0x16b4   :  { %v2387_v15 = vmul.f32 %v2379_v14, %v4481_v3  ;;  %v1802_v14 = vadd.f32 %v1794_v11, %v4522_v31  ;;  %v1797_v27 = vmul.f32 %v1789_v43, %v4535_v51  ;;  %v1799_v50 = vmul.f32 %v1791_v7, %v4559_v9 }
0x16b5   :  { %v2369_v43 = vmul.f32 0.5, %v4510_v29 }
0x16b6   :  { %v2395_v32 = vadd.f32 %v2387_v15, %v4481_v3  ;;  %v2409_v15 = vmul.f32 0.7978846, %v2401_v36  ;;  %v1810_v16 = vmul.f32 0.7978846, %v1802_v14  ;;  %v1805_v41 = vadd.f32 %v1797_v27, %v4535_v51 }
0x16b7   :  { %v2365_v3 = vmul.f32 0.5, %v4487_v10  ;;  %v1807_v35 = vadd.f32 %v1799_v50, %v4559_v9  ;;  %v1772_v27 = vmul.f32 0.5, %v4539_v52 }
0x16b8   :  { %v2403_v54 = vmul.f32 0.7978846, %v2395_v32  ;;  %v1804_v32 = vadd.f32 %v1796_v17, %v4539_v52  ;;  %v1813_v40 = vmul.f32 0.7978846, %v1805_v41  ;;  %v1775_v52 = vmul.f32 0.5, %v4559_v9  ;;  %v2790_v9 = vld [vmem:[%s4684_s21 + $0x10] sm:$0xff] }
0x16b9   :  { %v1815_v20 = vmul.f32 0.7978846, %v1807_v35  ;;  %v4628_v35 = vld [vmem:[%s4683_s20] ss:$0 sm:$0xff] }
0x16ba   :  { %3713 = vtanh.f32 %v2403_v54  ;;  %v1812_v57 = vmul.f32 0.7978846, %v1804_v32  ;;  %v1774_v32 = vmul.f32 0.5, %v4551_v0  ;;  %v2789_v0 = vld [vmem:[%s4684_s21 + $0x8] sm:$0xff] }
0x16bb   :  { %3715 = vtanh.f32 %v2404_v61 }
0x16bc   :  { %3717 = vtanh.f32 %v2405_v49 }
0x16bd   :  { %3719 = vtanh.f32 %v2406_v8  ;;  %v2367_v8 = vmul.f32 0.5, %v4495_v6 }
0x16be   :  { %3721 = vtanh.f32 %v2407_v45 }
0x16bf   :  { %3723 = vtanh.f32 %v2408_v18 }
0x16c0   :  { %3725 = vtanh.f32 %v2409_v15  ;;  %v1771_v15 = vmul.f32 0.5, %v4518_v21 }
0x16c1   :  { %3727 = vtanh.f32 %v1810_v16 }
0x16c2   :  { %3729 = vtanh.f32 %v1811_v33 }
0x16c3   :  { %3731 = vtanh.f32 %v1812_v57 }
0x16c4   :  { %v3714_v28 = vpop.eup %3713  ;;  %3733 = vtanh.f32 %v1813_v40 }
0x16c5   :  { %v3716_v22 = vpop.eup %3715  ;;  %v2419_v48 = vadd.f32 1.0, %v3714_v28  ;;  %3735 = vtanh.f32 %v1814_v5 }
0x16c6   :  { %v3718_v39 = vpop.eup %3717  ;;  %v2420_v54 = vadd.f32 1.0, %v3716_v22  ;;  %3737 = vtanh.f32 %v1815_v20 }
0x16c7   :  { %v3720_v55 = vpop.eup %3719  ;;  %v2427_v59 = vmul.f32 %v2419_v48, %v2363_v30  ;;  %v2421_v61 = vadd.f32 1.0, %v3718_v39  ;;  %v2791_v30 = vld [vmem:[%s4684_s21 + $0x18] sm:$0xff] }
0x16c8   :  { %v3722_v63 = vpop.eup %3721  ;;  %v2428_v4 = vmul.f32 %v2420_v54, %v2364_v34  ;;  %v2422_v2 = vadd.f32 1.0, %v3720_v55  ;;  %v3570_v48 = vpack.c.bf16 %v2791_v30, %v2790_v9 }
0x16c9   :  { %v3724_v49 = vpop.eup %3723  ;;  %v2429_v53 = vmul.f32 %v2421_v61, %v2365_v3  ;;  %v2423_v10 = vadd.f32 1.0, %v3722_v63 }
0x16ca   :  { %v3726_v11 = vpop.eup %3725  ;;  %v2430_v44 = vmul.f32 %v2422_v2, %v2366_v1  ;;  %v2424_v13 = vadd.f32 1.0, %v3724_v49 }
0x16cb   :  { %v3728_v36 = vpop.eup %3727  ;;  %v2431_v45 = vmul.f32 %v2423_v10, %v2367_v8  ;;  %v2425_v6 = vadd.f32 1.0, %v3726_v11 }
0x16cc   :  { %v3730_v18 = vpop.eup %3729  ;;  %v2432_v19 = vmul.f32 %v2424_v13, %v2368_v62  ;;  %v1826_v47 = vadd.f32 1.0, %v3728_v36 }
0x16cd   :  { %v3732_v14 = vpop.eup %3731  ;;  %v2433_v23 = vmul.f32 %v2425_v6, %v2369_v43  ;;  %v1827_v12 = vadd.f32 1.0, %v3730_v18 }
0x16ce   :  { %v3734_v17 = vpop.eup %3733 }
0x16cf   :  { %v3736_v29 = vpop.eup %3735  ;;  %v1835_v28 = vmul.f32 %v1827_v12, %v1771_v15  ;;  %v1829_v7 = vadd.f32 1.0, %v3734_v17 }
0x16d0   :  { %v3738_v25 = vpop.eup %3737  ;;  %v1830_v22 = vadd.f32 1.0, %v3736_v29 }
0x16d1   :  { %v1831_v38 = vadd.f32 1.0, %v3738_v25 }
0x16d2   :  { %v1838_v16 = vmul.f32 %v1830_v22, %v1774_v32 }
0x16d3   :  { %v1839_v33 = vmul.f32 %v1831_v38, %v1775_v52 }
0x1722   :  { %v1618_v46 = vpop.permute.xlu1 %1617 }
0x1723   :  { %1621 = vst.msk [vmem:[#allocation3 + $0x38] sm:$0xff] %vm823_vm7, %v1618_v46  ;;  %v1828_v46 = vadd.f32 1.0, %v3732_v14 }
0x1725   :  { %v1836_v60 = vmul.f32 %v1828_v46, %v1772_v27 }
0x172a   :  { %v1629_v58 = vld [vmem:[#allocation3 + $0x38] sm:$0xff] }
0x172b   :  { %3394 = vmatmul.mubr.msk.f32.gmra.mrb[32].mxu0 %vm823_vm7, %v1629_v58 }
0x172c   :  { %3442 = vmatprep.mubr.msk.f32.mxu0 %vm2438_vm4, %v2426_v37 }
0x172f   :  { %3443 = vmatmul.mubr.msk.f32.vlgmr.msra.gmra.mrb[34].mxu0 %vm2438_vm4, %v2427_v59 }
0x1730   :  { %3445 = vmatprep.mubr.msk.f32.mxu0 %vm2438_vm4, %v2428_v4  ;;  %3565 = vmatpush3.bf16.msra.mxu0 %v4473_v42  ;;  %v1770_v42 = vmul.f32 0.5, %v4522_v31  ;;  %v1773_v31 = vmul.f32 0.5, %v4535_v51  ;;  %v2788_v51 = vld [vmem:[%s4684_s21] sm:$0xff] }
0x1731   :  { %v3566_v41 = vpack.c.bf16 %v2789_v0, %v2788_v51 }
0x1732   :  { %v1834_v24 = vmul.f32 %v1826_v47, %v1770_v42  ;;  %v1837_v21 = vmul.f32 %v1829_v7, %v1773_v31 }
0x1733   :  { %3446 = vmatmul.mubr.msk.f32.gmra.mrb[36].mxu0 %vm2438_vm4, %v2429_v53  ;;  %3567 = vmatprep.subr.bf16.mxu1 %v3566_v41 }
0x1734   :  { %3448 = vmatprep.mubr.msk.f32.mxu0 %vm2438_vm4, %v2430_v44  ;;  %3569 = vmatpush3.bf16.msra.mxu1 %v3566_v41 }
0x1735   :  { %3571 = vmatprep.subr.bf16.mxu1 %v3570_v48 }
0x1737   :  { %3449 = vmatmul.mubr.msk.f32.gmra.mrb[38].mxu0 %vm2438_vm4, %v2431_v45 }
0x1738   :  { %3451 = vmatprep.mubr.msk.f32.mxu0 %vm2438_vm4, %v2432_v19  ;;  %3573 = vmatpush3.bf16.msra.mxu1 %v3570_v48 }
0x173b   :  { %3452 = vmatmul.mubr.msk.f32.gmra.mrb[40].mxu0 %vm2438_vm4, %v2433_v23 }
0x173c   :  { %3458 = vmatprep.mubr.msk.f32.mxu0 %vm314_vm2, %v1834_v24 }
0x173f   :  { %3459 = vmatmul.mubr.msk.f32.vlgmr.msra.gmra.mrb[34].mxu0 %vm314_vm2, %v1835_v28 }
0x1740   :  { %3461 = vmatprep.mubr.msk.f32.mxu0 %vm314_vm2, %v1836_v60 }
0x1743   :  { %3462 = vmatmul.mubr.msk.f32.gmra.mrb[36].mxu0 %vm314_vm2, %v1837_v21 }
0x1744   :  { %3464 = vmatprep.mubr.msk.f32.mxu0 %vm314_vm2, %v1838_v16 }
0x1747   :  { %3465 = vmatmul.mubr.msk.f32.gmra.mrb[38].mxu0 %vm314_vm2, %v1839_v33 }
0x17fe   :  { %v3395_v39 = vpop.f32.mrb[32].mxu0 }
0x17ff   :  { %v1767_v50 = vadd.f32 %v3395_v39, %v4505_v26  ;;  %v1761_v37 = vpop.f32.mrb[33].mxu0 }
0x1800   :  { %v1762_v34 = vadd.f32 %v4505_v26, %v1761_v37 }
0x1801   :  { %v1785_v54 = vmul.f32 0.044715, %v1767_v50  ;;  %v1777_v6 = vmul.f32 0.5, %v1767_v50 }
0x1802   :  { %v1784_v55 = vmul.f32 0.044715, %v1762_v34  ;;  %v1776_v20 = vmul.f32 0.5, %v1762_v34 }
0x1803   :  { %v1793_v56 = vmul.f32 %v1785_v54, %v1767_v50 }
0x1804   :  { %v1792_v57 = vmul.f32 %v1784_v55, %v1762_v34 }
0x1805   :  { %v1801_v58 = vmul.f32 %v1793_v56, %v1767_v50 }
0x1806   :  { %v1800_v59 = vmul.f32 %v1792_v57, %v1762_v34 }
0x1807   :  { %v1809_v3 = vadd.f32 %v1801_v58, %v1767_v50 }
0x1808   :  { %v1808_v61 = vadd.f32 %v1800_v59, %v1762_v34 }
0x1809   :  { %v1817_v40 = vmul.f32 0.7978846, %v1809_v3 }
0x180a   :  { %v1816_v63 = vmul.f32 0.7978846, %v1808_v61 }
0x180b   :  { %3739 = vtanh.f32 %v1817_v40 }
0x180c   :  { %3741 = vtanh.f32 %v1816_v63 }
0x1812   :  { %v3460_v4 = vpop.f32.mrb[34].mxu0 }
0x1813   :  { %v2709_v26 = vadd.f32 %v3460_v4, %v4628_v35  ;;  %v2662_v1 = vpop.f32.mrb[35].mxu0 }
0x1814   :  { %v2708_v2 = vadd.f32 %v4628_v35, %v2662_v1 }
0x1815   :  { %v3740_v49 = vpop.eup %3739  ;;  %v2725_v5 = vmul.f32 0.044715, %v2709_v26  ;;  %v2717_v56 = vmul.f32 0.5, %v2709_v26 }
0x1816   :  { %v3742_v53 = vpop.eup %3741  ;;  %v2724_v8 = vmul.f32 0.044715, %v2708_v2  ;;  %v3463_v10 = vpop.f32.mrb[36].mxu0  ;;  %v1833_v11 = vadd.f32 1.0, %v3740_v49  ;;  %v2716_v54 = vmul.f32 0.5, %v2708_v2 }
0x1817   :  { %v2733_v44 = vmul.f32 %v2725_v5, %v2709_v26  ;;  %v2711_v62 = vadd.f32 %v3463_v10, %v4628_v35  ;;  %v2672_v13 = vpop.f32.mrb[37].mxu0  ;;  %v1832_v36 = vadd.f32 1.0, %v3742_v53 }
0x1818   :  { %v2732_v45 = vmul.f32 %v2724_v8, %v2708_v2  ;;  %v2710_v43 = vadd.f32 %v4628_v35, %v2672_v13  ;;  %v1841_v17 = vmul.f32 %v1833_v11, %v1777_v6 }
0x1819   :  { %v2741_v18 = vmul.f32 %v2733_v44, %v2709_v26  ;;  %v2727_v19 = vmul.f32 0.044715, %v2711_v62  ;;  %v1840_v47 = vmul.f32 %v1832_v36, %v1776_v20  ;;  %v2719_v4 = vmul.f32 0.5, %v2711_v62 }
0x181a   :  { %v2740_v14 = vmul.f32 %v2732_v45, %v2708_v2  ;;  %v2726_v23 = vmul.f32 0.044715, %v2710_v43  ;;  %v3466_v42 = vpop.f32.mrb[38].mxu0  ;;  %v2718_v40 = vmul.f32 0.5, %v2710_v43 }
0x181b   :  { %v2749_v12 = vadd.f32 %v2741_v18, %v2709_v26  ;;  %v2735_v24 = vmul.f32 %v2727_v19, %v2711_v62  ;;  %v2713_v46 = vadd.f32 %v3466_v42, %v4628_v35  ;;  %v2682_v29 = vpop.f32.mrb[39].mxu0  ;;  %3467 = vmatprep.mubr.msk.f32.mxu0 %vm314_vm2, %v1840_v47 }
0x181c   :  { %v2748_v15 = vadd.f32 %v2740_v14, %v2708_v2  ;;  %v2734_v27 = vmul.f32 %v2726_v23, %v2710_v43  ;;  %v2712_v28 = vadd.f32 %v4628_v35, %v2682_v29  ;;  %3468 = vmatmul.mubr.msk.f32.gmra.mrb[40].mxu0 %vm314_vm2, %v1841_v17 }
0x181d   :  { %v2757_v7 = vmul.f32 0.7978846, %v2749_v12  ;;  %v2743_v25 = vmul.f32 %v2735_v24, %v2711_v62  ;;  %v2729_v60 = vmul.f32 0.044715, %v2713_v46  ;;  %v2721_v10 = vmul.f32 0.5, %v2713_v46 }
0x181e   :  { %v2742_v22 = vmul.f32 %v2734_v27, %v2710_v43  ;;  %v2728_v31 = vmul.f32 0.044715, %v2712_v28  ;;  %v2756_v32 = vmul.f32 0.7978846, %v2748_v15  ;;  %v2720_v26 = vmul.f32 0.5, %v2712_v28 }
0x181f   :  { %3743 = vtanh.f32 %v2757_v7  ;;  %v2751_v21 = vadd.f32 %v2743_v25, %v2711_v62  ;;  %v2737_v38 = vmul.f32 %v2729_v60, %v2713_v46  ;;  %v3070_v12 = vld [vmem:[%s4685_s22] ss:$0 sm:$0xff]  ;;  %s3797_s22 = smov [#allocation4]  }
0x1820   :  { %v2750_v16 = vadd.f32 %v2742_v22, %v2710_v43  ;;  %v2736_v52 = vmul.f32 %v2728_v31, %v2712_v28  ;;  %3745 = vtanh.f32 %v2756_v32  ;;  %s2941_s24 = sshll.u32 %s3797_s22, 4  ;;  %s2942_s24 = int_to_ptr.vmem [resolvable:$true] %s2941_s24 }
0x1821   :  { %v2745_v33 = vmul.f32 %v2737_v38, %v2713_v46  ;;  %v2759_v51 = vmul.f32 0.7978846, %v2751_v21  ;;  %s3767_s25 = scalar_lea.vmem %s2942_s24, 1024  ;;  %p3772_p1 = scmp.lt.s32.totalorder %s2942_s24, %s2942_s24 }
0x1822   :  { %v2744_v0 = vmul.f32 %v2736_v52, %v2712_v28  ;;  %v2758_v41 = vmul.f32 0.7978846, %v2750_v16  ;;  %p3768_p0 = scmp.ne.s32.totalorder %s2942_s24, %s3767_s25  ;;  %p3773_p2 = scmp.lt.s32.totalorder %s3767_s25, %s3767_s25 }
0x1823   :  { %v2753_v9 = vadd.f32 %v2745_v33, %v2713_v46  ;;  %3747 = vtanh.f32 %v2759_v51 }
0x1824   :  { %v2752_v30 = vadd.f32 %v2744_v0, %v2712_v28  ;;  %3749 = vtanh.f32 %v2758_v41  ;;  %p3774_p3 = por %p3773_p2, %p3772_p1 }
0x1825   :  { %v2761_v48 = vmul.f32 0.7978846, %v2753_v9 }
0x1826   :  { %v2760_v39 = vmul.f32 0.7978846, %v2752_v30  ;;  %p3775_p4 = pnand %p3774_p3, %p3768_p0 }
0x1827   :  { %3751 = vtanh.f32 %v2761_v48 }
0x1828   :  { %3753 = vtanh.f32 %v2760_v39 }
0x1829   :  { %v3744_v50 = vpop.eup %3743 }
0x182a   :  { %v3746_v37 = vpop.eup %3745  ;;  %v2773_v34 = vadd.f32 1.0, %v3744_v50 }
0x182b   :  { %v2772_v55 = vadd.f32 1.0, %v3746_v37 }
0x182c   :  { %v2781_v3 = vmul.f32 %v2773_v34, %v2717_v56 }
0x182d   :  { %v3748_v57 = vpop.eup %3747  ;;  %v2780_v58 = vmul.f32 %v2772_v55, %v2716_v54 }
0x182e   :  { %v3750_v59 = vpop.eup %3749  ;;  %v2775_v61 = vadd.f32 1.0, %v3748_v57 }
0x182f   :  { %3478 = vmatprep.mubr.msk.f32.mxu1 %vm823_vm7, %v2780_v58  ;;  %v2774_v63 = vadd.f32 1.0, %v3750_v59 }
0x1830   :  { %3479 = vmatmul.mubr.msk.f32.vlgmr.msra.gmra.mrb[24].mxu1 %vm823_vm7, %v2781_v3  ;;  %v2783_v53 = vmul.f32 %v2775_v61, %v2719_v4 }
0x1831   :  { %v3752_v1 = vpop.eup %3751  ;;  %v2782_v49 = vmul.f32 %v2774_v63, %v2718_v40 }
0x1832   :  { %v3754_v5 = vpop.eup %3753  ;;  %v2777_v8 = vadd.f32 1.0, %v3752_v1 }
0x1833   :  { %3481 = vmatprep.mubr.msk.f32.mxu1 %vm823_vm7, %v2782_v49  ;;  %v2776_v2 = vadd.f32 1.0, %v3754_v5 }
0x1834   :  { %3482 = vmatmul.mubr.msk.f32.gmra.mrb[26].mxu1 %vm823_vm7, %v2783_v53  ;;  %v2785_v44 = vmul.f32 %v2777_v8, %v2721_v10 }
0x1835   :  { %v2784_v11 = vmul.f32 %v2776_v2, %v2720_v26 }
0x1837   :  { %3484 = vmatprep.mubr.msk.f32.mxu1 %vm823_vm7, %v2784_v11 }
0x1838   :  { %3485 = vmatmul.mubr.msk.f32.gmra.mrb[28].mxu1 %vm823_vm7, %v2785_v44 }
0x18ef   :  { %v3469_v13 = vpop.f32.mrb[40].mxu0 }
0x18f0   :  { %v2715_v62 = vadd.f32 %v3469_v13, %v4628_v35  ;;  %v2692_v20 = vpop.f32.mrb[41].mxu0 }
0x18f1   :  { %v2714_v36 = vadd.f32 %v4628_v35, %v2692_v20 }
0x18f2   :  { %v2731_v45 = vmul.f32 0.044715, %v2715_v62  ;;  %v2723_v21 = vmul.f32 0.5, %v2715_v62 }
0x18f3   :  { %v2730_v43 = vmul.f32 0.044715, %v2714_v36  ;;  %v2722_v22 = vmul.f32 0.5, %v2714_v36 }
0x18f4   :  { %v2739_v6 = vmul.f32 %v2731_v45, %v2715_v62 }
0x18f5   :  { %v2738_v18 = vmul.f32 %v2730_v43, %v2714_v36 }
0x18f6   :  { %v2747_v19 = vmul.f32 %v2739_v6, %v2715_v62 }
0x18f7   :  { %v2746_v47 = vmul.f32 %v2738_v18, %v2714_v36 }
0x18f8   :  { %v2755_v14 = vadd.f32 %v2747_v19, %v2715_v62 }
0x18f9   :  { %v2754_v23 = vadd.f32 %v2746_v47, %v2714_v36 }
0x18fa   :  { %v2763_v42 = vmul.f32 0.7978846, %v2755_v14 }
0x18fb   :  { %v2762_v17 = vmul.f32 0.7978846, %v2754_v23 }
0x18fc   :  { %3755 = vtanh.f32 %v2763_v42 }
0x18fd   :  { %3757 = vtanh.f32 %v2762_v17 }
0x1903   :  { %v3480_v24 = vpop.f32.mrb[24].mxu1 }
0x1904   :  { %v2895_v46 = vadd.f32 %v3480_v24, %v3070_v12  ;;  %v2889_v29 = vpop.f32.mrb[25].mxu1 }
0x1905   :  { %v2890_v35 = vadd.f32 %v3070_v12, %v2889_v29 }
0x1906   :  { %v3756_v15 = vpop.eup %3755  ;;  %2929 = vst [vmem:[#allocation4 + $0x8] sm:$0xff] %v2895_v46 }
0x1907   :  { %v3758_v27 = vpop.eup %3757  ;;  %2928 = vst [vmem:[#allocation4] sm:$0xff] %v2890_v35  ;;  %v3483_v28 = vpop.f32.mrb[26].mxu1  ;;  %v2779_v7 = vadd.f32 1.0, %v3756_v15 }
0x1908   :  { %v2905_v25 = vadd.f32 %v3483_v28, %v3070_v12  ;;  %v2899_v60 = vpop.f32.mrb[27].mxu1  ;;  %v2778_v31 = vadd.f32 1.0, %v3758_v27 }
0x1909   :  { %v2900_v32 = vadd.f32 %v3070_v12, %v2899_v60  ;;  %v2787_v52 = vmul.f32 %v2779_v7, %v2723_v21 }
0x190a   :  { %2931 = vst [vmem:[#allocation4 + $0x18] sm:$0xff] %v2905_v25  ;;  %v2786_v38 = vmul.f32 %v2778_v31, %v2722_v22 }
0x190b   :  { %2930 = vst [vmem:[#allocation4 + $0x10] sm:$0xff] %v2900_v32  ;;  %v3486_v16 = vpop.f32.mrb[28].mxu1 }
0x190c   :  { %v2915_v33 = vadd.f32 %v3486_v16, %v3070_v12  ;;  %v2909_v51 = vpop.f32.mrb[29].mxu1  ;;  %3487 = vmatprep.mubr.msk.f32.mxu1 %vm823_vm7, %v2786_v38 }
0x190d   :  { %v2910_v0 = vadd.f32 %v3070_v12, %v2909_v51  ;;  %3488 = vmatmul.mubr.msk.f32.gmra.mrb[30].mxu1 %vm823_vm7, %v2787_v52 }
0x190e   :  { %2933 = vst [vmem:[#allocation4 + $0x28] sm:$0xff] %v2915_v33 }
0x190f   :  { %2932 = vst [vmem:[#allocation4 + $0x20] sm:$0xff] %v2910_v0 }
0x19e0   :  { %v3489_v41 = vpop.f32.mrb[30].mxu1 }
0x19e1   :  { %v2925_v9 = vadd.f32 %v3489_v41, %v3070_v12  ;;  %v2919_v30 = vpop.f32.mrb[31].mxu1 }
0x19e2   :  { %v2920_v48 = vadd.f32 %v3070_v12, %v2919_v30 }
0x19e3   :  { %2935 = vst [vmem:[#allocation4 + $0x38] sm:$0xff] %v2925_v9 }
0x19e4   :  { %2934 = vst [vmem:[#allocation4 + $0x30] sm:$0xff] %v2920_v48 }
0x19e5   :  { %3778 = shalt.err (!%p3775_p4)
}
0x19e6   :  { %s3779_s5 = scalar_lea.hbm %s4686_s23, 1024 }
0x19e7   :  { %p3780_p5 = scmp.ne.s32.totalorder %s4686_s23, %s3779_s5  ;;  %p3783_p6 = scmp.lt.u32.totalorder %s3779_s5, %s4686_s23 }
0x19e9   :  { %p3785_p7 = pnand %p3783_p6, %p3780_p5 }
0x19eb   :  { %3788 = shalt.err (!%p3785_p7)
}
0x19ec   :  { %s3798_s10 = smov 128   ;;  %s3799_s9 = smov 8  }
0x19ed   :  { %2947 = dma.vmem_to_hbm [thread:$0]  %s2942_s24, 1024, %s4686_s23, [#allocation5], %s3798_s10, %s3798_s10, %s3799_s9  }
0x19ee   :  { %3789 = dma.done.wait [#allocation5], 1024  }
0x19ef   :  { %3790 = vsyncadd [#allocation5], 4294966272 }
0x19f0   :  { %2951 = vsyncpa [#allocation5], 1 }

</bundles_post_ra>
